<compile_context>
chip_gen: v6e
topology: v6e:2x2x1
jax: 0.10.0
libtpu: 0.0.40
codegen_flags: <defaults>
</compile_context>

<pallas_src>
import math
from functools import partial

import jax
import jax.numpy as jnp
from jax.experimental import pallas as pl
from jax.experimental.pallas import tpu as pltpu


# ----------------------------- small helpers --------------------------------

def _layer_norm(v, gamma, beta, eps=1e-5):
    mu = jnp.mean(v, axis=-1, keepdims=True)
    var = jnp.mean((v - mu) ** 2, axis=-1, keepdims=True)
    return (v - mu) * jax.lax.rsqrt(var + eps) * gamma + beta


def _gelu_exact(x):
    # torch.nn.functional.gelu default (erf formulation).
    # TODO(synk): jax.nn.gelu(approximate=True) would move this onto the EUP
    # slot (biggest relative win on v5e) at a small deviation from torch.
    return 0.5 * x * (1.0 + jax.lax.erf(x * (1.0 / math.sqrt(2.0))))


def _split_heads(x2d, num_heads, head_dim):
    # (T, H*hd) -> (H, T, hd).  Only used in the QKV prologue, once per
    # sequence tile (NOT once per kv step as before).
    return jnp.stack(
        [x2d[:, h * head_dim:(h + 1) * head_dim] for h in range(num_heads)],
        axis=0)


def _merge_heads(x3d):
    # (H, T, hd) -> (T, H*hd); once per q-tile at attention finalize.
    return jnp.concatenate([x3d[h] for h in range(x3d.shape[0])], axis=-1)


def _pick_tile(n, target, mult):
    """Largest multiple-of-`mult` divisor of n that is <= target (else n)."""
    t = min(target, n)
    t -= t % mult
    while t >= mult:
        if n % t == 0:
            return t
        t -= mult
    return n


def _default_vmem_limit_bytes():
    # Derive the budget from the chip instead of hard-coding 64 MiB:
    # ~112-117 MiB on 128 MiB chips (v5e/v6e), ~56 MiB on v7x.
    try:
        cap = int(pltpu.get_tpu_info().vmem_capacity_bytes)
        if cap >= 32 * 1024 * 1024:
            return min(cap - cap // 8, 120 * 1024 * 1024)
    except Exception:
        pass
    return 64 * 1024 * 1024


# ------------------------------- kernels -------------------------------------

def qkv_proj_kernel(x_ref, g_ref, b_ref, wqkv_ref, q_ref, k_ref, v_ref,
                    *, num_heads, head_dim, attn_dim):
    """LN1 + fused QKV projection; emits head-split bf16 Q(scaled)/K/V."""
    xn = _layer_norm(x_ref[0], g_ref[...], b_ref[...])                 # (ts, D) f32
    qkv = jnp.dot(xn.astype(jnp.bfloat16), wqkv_ref[...],
                  preferred_element_type=jnp.float32)                  # (ts, 3*Di)
    q_ref[0] = _split_heads(qkv[:, :attn_dim],
                            num_heads, head_dim).astype(q_ref.dtype)
    k_ref[0] = _split_heads(qkv[:, attn_dim:2 * attn_dim],
                            num_heads, head_dim).astype(k_ref.dtype)
    v_ref[0] = _split_heads(qkv[:, 2 * attn_dim:],
                            num_heads, head_dim).astype(v_ref.dtype)


def flash_attn_kernel(xq_ref, q_ref, k_ref, v_ref, wo_ref, bo_ref,
                      h_ref, m_scr, l_scr, acc_scr):
    """Online-softmax attention over kv tiles + out-proj + residual."""
    j = pl.program_id(2)
    nj = pl.num_programs(2)

    @pl.when(j == 0)
    def _init():
        m_scr[...] = jnp.full(m_scr.shape, -jnp.inf, dtype=m_scr.dtype)
        l_scr[...] = jnp.zeros(l_scr.shape, dtype=l_scr.dtype)
        acc_scr[...] = jnp.zeros(acc_scr.shape, dtype=acc_scr.dtype)

    q = q_ref[0]                                   # (H, tq, hd) bf16, pre-scaled
    k = k_ref[0]                                   # (H, tk, hd) bf16
    v = v_ref[0]                                   # (H, tk, hd) bf16
    s = jnp.einsum("hqd,hkd->hqk", q, k,
                   preferred_element_type=jnp.float32)                 # (H, tq, tk)
    m_prev = m_scr[...]
    m_new = jnp.maximum(m_prev, jnp.max(s, axis=-1, keepdims=True))
    alpha = jnp.exp(m_prev - m_new)
    p = jnp.exp(s - m_new)
    l_scr[...] = alpha * l_scr[...] + jnp.sum(p, axis=-1, keepdims=True)
    acc_scr[...] = alpha * acc_scr[...] + jnp.einsum(
        "hqk,hkd->hqd", p.astype(jnp.bfloat16), v,
        preferred_element_type=jnp.float32)
    m_scr[...] = m_new

    @pl.when(j == nj - 1)
    def _finalize():
        attn_h = acc_scr[...] * pl.reciprocal(l_scr[...], approx=True)  # (H, tq, hd)
        attn2d = _merge_heads(attn_h)                                   # (tq, Di)
        attn = jnp.dot(attn2d.astype(jnp.bfloat16), wo_ref[...],
                       preferred_element_type=jnp.float32) + bo_ref[...]
        h_ref[0] = (xq_ref[0] + attn).astype(h_ref.dtype)               # residual 1


def geglu_ff_kernel(h_ref, g_ref, b_ref, wgv_ref, bgv_ref, wgg_ref, bgg_ref,
                    w2_ref, b2_ref, o_ref, xn_scr, acc_scr):
    """LN3 + GEGLU feed-forward with the inner (4*D) dim chunked on grid axis 2."""
    c = pl.program_id(2)
    nc = pl.num_programs(2)

    @pl.when(c == 0)
    def _init():
        xn_scr[...] = _layer_norm(h_ref[0], g_ref[...],
                                  b_ref[...]).astype(xn_scr.dtype)
        acc_scr[...] = jnp.zeros(acc_scr.shape, dtype=acc_scr.dtype)

    xn = xn_scr[...]                                                    # (tf, D) bf16
    val = jnp.dot(xn, wgv_ref[...],
                  preferred_element_type=jnp.float32) + bgv_ref[...]    # (tf, fc)
    gate = jnp.dot(xn, wgg_ref[...],
                   preferred_element_type=jnp.float32) + bgg_ref[...]   # (tf, fc)
    hid = (val * _gelu_exact(gate)).astype(jnp.bfloat16)
    acc_scr[...] += jnp.dot(hid, w2_ref[...],
                            preferred_element_type=jnp.float32)

    @pl.when(c == nc - 1)
    def _finalize():
        o_ref[0] = (h_ref[0] + acc_scr[...] + b2_ref[...]).astype(o_ref.dtype)


# ------------------------------- wrapper --------------------------------------

def basic_transformer_block(x, params, *, num_heads, head_dim,
                            block_q=None, block_kv=None,
                            block_ff_rows=None, block_ff_inner=None,
                            vmem_limit_bytes=None):
    B, S, D = x.shape
    Di = num_heads * head_dim
    F = params["w_ff2"].shape[0]                   # 4 * D
    assert params["w_geglu"].shape[1] == 2 * F

    # 256-tiles fill the v6e/v7x 256-wide MXUs; pass block_q=block_kv=128 on v5e.
    # On v7x keep B * (S // block_q) even so both TensorCores get work.
    tq = block_q or _pick_tile(S, 256, 8)
    tk = block_kv or _pick_tile(S, 256, 8)
    tf = block_ff_rows or tq
    fc = block_ff_inner or _pick_tile(F, 2048, 128)
    assert S % tq == 0 and S % tk == 0 and S % tf == 0 and F % fc == 0

    vlim = vmem_limit_bytes or _default_vmem_limit_bytes()
    bf16 = jnp.bfloat16
    scale = 1.0 / math.sqrt(head_dim)

    # Fused QKV weight with the attention scale folded into the Q columns.
    w_qkv = jnp.concatenate(
        [params["w_q"] * scale, params["w_k"], params["w_v"]], axis=1).astype(bf16)
    w_o = params["w_o"].astype(bf16)
    w_gv = params["w_geglu"][:, :F].astype(bf16)   # GEGLU "value" half
    w_gg = params["w_geglu"][:, F:].astype(bf16)   # GEGLU "gate" half
    b_gv = params["b_geglu"][:, :F]
    b_gg = params["b_geglu"][:, F:]
    w_2 = params["w_ff2"].astype(bf16)

    def wspec(w):
        # Whole-array weight block with a constant block index: DMA'd once and
        # the VMEM buffer is reused for every grid step.
        # TODO(synk): on v7x add pipeline_mode=pl.Buffered(1) here (constant
        # index blocks gain nothing from double buffering) to halve weight VMEM.
        nd = w.ndim
        return pl.BlockSpec(w.shape, lambda *_: (0,) * nd)

    # ---- kernel 1: LN1 + fused QKV projection (once per token) ----
    qkv_shape = jax.ShapeDtypeStruct((B, num_heads, S, head_dim), bf16)
    q, k, v = pl.pallas_call(
        partial(qkv_proj_kernel, num_heads=num_heads, head_dim=head_dim,
                attn_dim=Di),
        out_shape=(qkv_shape, qkv_shape, qkv_shape),
        grid_spec=pltpu.PrefetchScalarGridSpec(
            num_scalar_prefetch=0,
            grid=(B, S // tq),
            in_specs=[
                pl.BlockSpec((1, tq, D), lambda b, i: (b, i, 0)),
                wspec(params["ln1_g"]), wspec(params["ln1_b"]), wspec(w_qkv),
            ],
            out_specs=[
                pl.BlockSpec((1, num_heads, tq, head_dim),
                             lambda b, i: (b, 0, i, 0)),
                pl.BlockSpec((1, num_heads, tq, head_dim),
                             lambda b, i: (b, 0, i, 0)),
                pl.BlockSpec((1, num_heads, tq, head_dim),
                             lambda b, i: (b, 0, i, 0)),
            ],
        ),
        compiler_params=pltpu.CompilerParams(
            dimension_semantics=("parallel", "parallel"),
            vmem_limit_bytes=vlim),
    )(x, params["ln1_g"], params["ln1_b"], w_qkv)

    # ---- kernel 2: flash attention + out-proj + residual ----
    h1 = pl.pallas_call(
        flash_attn_kernel,
        out_shape=jax.ShapeDtypeStruct((B, S, D), jnp.float32),
        grid_spec=pltpu.PrefetchScalarGridSpec(
            num_scalar_prefetch=0,
            grid=(B, S // tq, S // tk),
            in_specs=[
                pl.BlockSpec((1, tq, D), lambda b, i, j: (b, i, 0)),      # residual
                pl.BlockSpec((1, num_heads, tq, head_dim),
                             lambda b, i, j: (b, 0, i, 0)),               # Q (by i)
                # TODO(synk): pipeline_mode=pl.Buffered(3) on K/V if profiling
                # shows exposed kv DMA at large S.
                pl.BlockSpec((1, num_heads, tk, head_dim),
                             lambda b, i, j: (b, 0, j, 0)),               # K (by j)
                pl.BlockSpec((1, num_heads, tk, head_dim),
                             lambda b, i, j: (b, 0, j, 0)),               # V (by j)
                wspec(w_o), wspec(params["b_o"]),
            ],
            out_specs=pl.BlockSpec((1, tq, D), lambda b, i, j: (b, i, 0)),
            scratch_shapes=[
                pltpu.VMEM((num_heads, tq, 1), jnp.float32),              # m
                pltpu.VMEM((num_heads, tq, 1), jnp.float32),              # l
                pltpu.VMEM((num_heads, tq, head_dim), jnp.float32),       # acc
            ],
        ),
        compiler_params=pltpu.CompilerParams(
            dimension_semantics=("parallel", "parallel", "arbitrary"),
            vmem_limit_bytes=vlim),
    )(x, q, k, v, w_o, params["b_o"])

    # ---- kernel 3: LN3 + GEGLU FF (inner dim chunked) + residual ----
    out = pl.pallas_call(
        geglu_ff_kernel,
        out_shape=jax.ShapeDtypeStruct((B, S, D), x.dtype),
        grid_spec=pltpu.PrefetchScalarGridSpec(
            num_scalar_prefetch=0,
            grid=(B, S // tf, F // fc),
            in_specs=[
                pl.BlockSpec((1, tf, D), lambda b, i, c: (b, i, 0)),      # h1
                wspec(params["ln3_g"]), wspec(params["ln3_b"]),
                pl.BlockSpec((D, fc), lambda b, i, c: (0, c)),            # w_gv chunk
                pl.BlockSpec((1, fc), lambda b, i, c: (0, c)),            # b_gv chunk
                pl.BlockSpec((D, fc), lambda b, i, c: (0, c)),            # w_gg chunk
                pl.BlockSpec((1, fc), lambda b, i, c: (0, c)),            # b_gg chunk
                pl.BlockSpec((fc, D), lambda b, i, c: (c, 0)),            # w_ff2 chunk
                wspec(params["b_ff2"]),
            ],
            out_specs=pl.BlockSpec((1, tf, D), lambda b, i, c: (b, i, 0)),
            scratch_shapes=[
                pltpu.VMEM((tf, D), jnp.bfloat16),                        # LN3(h1)
                pltpu.VMEM((tf, D), jnp.float32),                         # ff acc
            ],
        ),
        compiler_params=pltpu.CompilerParams(
            dimension_semantics=("parallel", "parallel", "arbitrary"),
            vmem_limit_bytes=vlim),
    )(h1, params["ln3_g"], params["ln3_b"], w_gv, b_gv, w_gg, b_gg, w_2,
      params["b_ff2"])

    return out


# ------------------------- params / reference / test ---------------------------

def init_params(key, dim, num_heads, head_dim, mult=4):
    attn_inner = num_heads * head_dim
    ff_inner = dim * mult
    ks = jax.random.split(key, 8)
    std = 0.02

    def w(k, shape):
        return jax.random.normal(k, shape, jnp.float32) * std

    return {
        "ln1_g": jnp.ones((1, dim), jnp.float32),
        "ln1_b": jnp.zeros((1, dim), jnp.float32),
        "w_q": w(ks[0], (dim, attn_inner)),
        "w_k": w(ks[1], (dim, attn_inner)),
        "w_v": w(ks[2], (dim, attn_inner)),
        "w_o": w(ks[3], (attn_inner, dim)),
        "b_o": w(ks[4], (1, dim)),
        "ln3_g": jnp.ones((1, dim), jnp.float32),
        "ln3_b": jnp.zeros((1, dim), jnp.float32),
        "w_geglu": w(ks[5], (dim, 2 * ff_inner)),
        "b_geglu": w(ks[6], (1, 2 * ff_inner)),
        "w_ff2": w(ks[7], (ff_inner, dim)),
        "b_ff2": jnp.zeros((1, dim), jnp.float32),
    }


def reference_block(x, params, num_heads, head_dim):
    """Pure-JAX fp32 reference of the PyTorch forward (eval, dropout=0)."""
    def ln(v, g, b, eps=1e-5):
        mu = v.mean(-1, keepdims=True)
        var = ((v - mu) ** 2).mean(-1, keepdims=True)
        return (v - mu) * jax.lax.rsqrt(var + eps) * g + b

    B, S, _ = x.shape
    H, hd = num_heads, head_dim
    xn = ln(x, params["ln1_g"], params["ln1_b"])
    q = xn @ params["w_q"]
    k = xn @ params["w_k"]
    v = xn @ params["w_v"]

    def split(t):
        return t.reshape(B, S, H, hd).transpose(0, 2, 1, 3)

    s = jnp.einsum("bhqd,bhkd->bhqk", split(q), split(k)) / math.sqrt(hd)
    p = jax.nn.softmax(s, axis=-1)
    o = jnp.einsum("bhqk,bhkd->bhqd", p, split(v))
    o = o.transpose(0, 2, 1, 3).reshape(B, S, H * hd)
    h1 = x + (o @ params["w_o"] + params["b_o"])

    xn3 = ln(h1, params["ln3_g"], params["ln3_b"])
    proj = xn3 @ params["w_geglu"] + params["b_geglu"]
    F = params["w_ff2"].shape[0]
    val, gate = proj[..., :F], proj[..., F:]
    gelu = 0.5 * gate * (1.0 + jax.lax.erf(gate / math.sqrt(2.0)))
    ff = (val * gelu) @ params["w_ff2"] + params["b_ff2"]
    return h1 + ff


if __name__ == "__main__":
    B, S = 2, 256
    num_heads, head_dim = 2, 32
    dim = num_heads * head_dim  # 64

    key = jax.random.PRNGKey(0)
    k_x, k_p = jax.random.split(key)
    x = jax.random.normal(k_x, (B, S, dim), jnp.float32)
    params = init_params(k_p, dim, num_heads, head_dim)

    out = basic_transformer_block(
        x, params, num_heads=num_heads, head_dim=head_dim,
        # small tiles so the test exercises the kv-reduction (2 kv steps) and
        # the chunked-FF reduction (2 inner chunks); production defaults are 256.
        block_q=128, block_kv=128, block_ff_rows=128, block_ff_inner=128,
    )
    out = jax.block_until_ready(out)
    assert out.shape == (B, S, dim) and out.dtype == jnp.float32
    assert bool(jnp.all(jnp.isfinite(out)))

    ref = reference_block(x, params, num_heads, head_dim)
    max_err = float(jnp.max(jnp.abs(out - ref)))
    assert max_err < 5e-2, f"max abs error vs fp32 reference: {max_err}"

    # TODO(synk): dropout is identity in eval and omitted; ada_norm /
    # cross-attention / host-side chunked-feed-forward branches are config-off
    # and not implemented; attention_mask=None (no masking) is assumed.
    print("KERNEL_OK")
</pallas_src>

<mosaic_0001>
module attributes {stable_mosaic.version = 11 : i64} {
  func.func @qkv_proj_kernel(%arg0: i32, %arg1: i32, %arg2: memref<1x128x64xf32, #tpu.memory_space<vmem>>, %arg3: memref<1x64xf32, #tpu.memory_space<vmem>>, %arg4: memref<1x64xf32, #tpu.memory_space<vmem>>, %arg5: memref<64x192xbf16, #tpu.memory_space<vmem>>, %arg6: memref<1x2x128x32xbf16, #tpu.memory_space<vmem>>, %arg7: memref<1x2x128x32xbf16, #tpu.memory_space<vmem>>, %arg8: memref<1x2x128x32xbf16, #tpu.memory_space<vmem>>) attributes {dimension_semantics = [#tpu.dimension_semantics<parallel>, #tpu.dimension_semantics<parallel>], iteration_bounds = array<i64: 2, 2>, scalar_prefetch = 0 : i64, scratch_operands = 0 : i64, tpu.core_type = #tpu.core_type<tc>, window_params = [{transform_indices = @transform_0, window_bounds = array<i64: 1, 128, 64>}, {pipeline_mode = #tpu.pipeline_mode<synchronous>, transform_indices = @transform_1, window_bounds = array<i64: 1, 64>}, {pipeline_mode = #tpu.pipeline_mode<synchronous>, transform_indices = @transform_2, window_bounds = array<i64: 1, 64>}, {pipeline_mode = #tpu.pipeline_mode<synchronous>, transform_indices = @transform_3, window_bounds = array<i64: 64, 192>}, {transform_indices = @transform_4, window_bounds = array<i64: 1, 2, 128, 32>}, {transform_indices = @transform_5, window_bounds = array<i64: 1, 2, 128, 32>}, {transform_indices = @transform_6, window_bounds = array<i64: 1, 2, 128, 32>}]} {
    %c0 = arith.constant 0 : index
    %c0_0 = arith.constant 0 : index
    %c0_1 = arith.constant 0 : index
    %0 = vector.load %arg2[%c0, %c0_0, %c0_1] : memref<1x128x64xf32, #tpu.memory_space<vmem>>, vector<1x128x64xf32>
    %1 = vector.shape_cast %0 : vector<1x128x64xf32> to vector<128x64xf32>
    %c0_2 = arith.constant 0 : index
    %c0_3 = arith.constant 0 : index
    %2 = vector.load %arg3[%c0_2, %c0_3] : memref<1x64xf32, #tpu.memory_space<vmem>>, vector<1x64xf32>
    %c0_4 = arith.constant 0 : index
    %c0_5 = arith.constant 0 : index
    %3 = vector.load %arg4[%c0_4, %c0_5] : memref<1x64xf32, #tpu.memory_space<vmem>>, vector<1x64xf32>
    %cst = arith.constant dense<0.000000e+00> : vector<128xf32>
    %4 = vector.multi_reduction <add>, %1, %cst [1] : vector<128x64xf32> to vector<128xf32>
    %5 = vector.shape_cast %4 : vector<128xf32> to vector<128x1xf32>
    %cst_6 = arith.constant 6.400000e+01 : f32
    %6 = vector.broadcast %cst_6 : f32 to vector<128x1xf32>
    %7 = arith.divf %5, %6 : vector<128x1xf32>
    %8 = vector.broadcast %7 : vector<128x1xf32> to vector<128x64xf32>
    %9 = arith.subf %1, %8 : vector<128x64xf32>
    %10 = arith.mulf %9, %9 : vector<128x64xf32>
    %cst_7 = arith.constant dense<0.000000e+00> : vector<128xf32>
    %11 = vector.multi_reduction <add>, %10, %cst_7 [1] : vector<128x64xf32> to vector<128xf32>
    %12 = vector.shape_cast %11 : vector<128xf32> to vector<128x1xf32>
    %cst_8 = arith.constant 6.400000e+01 : f32
    %13 = vector.broadcast %cst_8 : f32 to vector<128x1xf32>
    %14 = arith.divf %12, %13 : vector<128x1xf32>
    %15 = vector.broadcast %7 : vector<128x1xf32> to vector<128x64xf32>
    %16 = arith.subf %1, %15 : vector<128x64xf32>
    %cst_9 = arith.constant 9.99999974E-6 : f32
    %17 = vector.broadcast %cst_9 : f32 to vector<128x1xf32>
    %18 = arith.addf %14, %17 : vector<128x1xf32>
    %19 = math.rsqrt %18 : vector<128x1xf32>
    %20 = vector.broadcast %19 : vector<128x1xf32> to vector<128x64xf32>
    %21 = arith.mulf %16, %20 : vector<128x64xf32>
    %22 = vector.broadcast %2 : vector<1x64xf32> to vector<128x64xf32>
    %23 = arith.mulf %21, %22 : vector<128x64xf32>
    %24 = vector.broadcast %3 : vector<1x64xf32> to vector<128x64xf32>
    %25 = arith.addf %23, %24 : vector<128x64xf32>
    %26 = arith.truncf %25 : vector<128x64xf32> to vector<128x64xbf16>
    %c0_10 = arith.constant 0 : index
    %c0_11 = arith.constant 0 : index
    %27 = vector.load %arg5[%c0_10, %c0_11] : memref<64x192xbf16, #tpu.memory_space<vmem>>, vector<64x192xbf16>
    %cst_12 = arith.constant dense<0.000000e+00> : vector<128x192xf32>
    %28 = tpu.matmul %26, %27, %cst_12 {dimension_numbers = #tpu.dot_dimension_numbers<[1], [0], [0], [1], [0, 0, 1, 1], [], []>} : vector<128x64xbf16>, vector<64x192xbf16>, vector<128x192xf32> -> vector<128x192xf32>
    %29 = vector.extract_strided_slice %28 {offsets = [0, 0], sizes = [128, 64], strides = [1, 1]} : vector<128x192xf32> to vector<128x64xf32>
    %30 = vector.extract_strided_slice %29 {offsets = [0, 0], sizes = [128, 32], strides = [1, 1]} : vector<128x64xf32> to vector<128x32xf32>
    %31 = vector.extract_strided_slice %29 {offsets = [0, 32], sizes = [128, 32], strides = [1, 1]} : vector<128x64xf32> to vector<128x32xf32>
    %32 = vector.shape_cast %30 : vector<128x32xf32> to vector<1x128x32xf32>
    %33 = vector.shape_cast %31 : vector<128x32xf32> to vector<1x128x32xf32>
    %34 = tpu.concatenate %32, %33 in 0 : vector<1x128x32xf32>, vector<1x128x32xf32> -> vector<2x128x32xf32>
    %35 = arith.truncf %34 : vector<2x128x32xf32> to vector<2x128x32xbf16>
    %c0_13 = arith.constant 0 : index
    %c0_14 = arith.constant 0 : index
    %c0_15 = arith.constant 0 : index
    %c0_16 = arith.constant 0 : index
    %36 = vector.load %arg6[%c0_13, %c0_14, %c0_15, %c0_16] : memref<1x2x128x32xbf16, #tpu.memory_space<vmem>>, vector<1x2x128x32xbf16>
    %37 = vector.shape_cast %36 : vector<1x2x128x32xbf16> to vector<2x128x32xbf16>
    %38 = vector.shape_cast %35 : vector<2x128x32xbf16> to vector<1x2x128x32xbf16>
    tpu.vector_store %arg6[%c0_13, %c0_14, %c0_15, %c0_16], %38 {strides = array<i32>} : memref<1x2x128x32xbf16, #tpu.memory_space<vmem>>, vector<1x2x128x32xbf16>,
    %39 = vector.extract_strided_slice %28 {offsets = [0, 64], sizes = [128, 64], strides = [1, 1]} : vector<128x192xf32> to vector<128x64xf32>
    %40 = vector.extract_strided_slice %39 {offsets = [0, 0], sizes = [128, 32], strides = [1, 1]} : vector<128x64xf32> to vector<128x32xf32>
    %41 = vector.extract_strided_slice %39 {offsets = [0, 32], sizes = [128, 32], strides = [1, 1]} : vector<128x64xf32> to vector<128x32xf32>
    %42 = vector.shape_cast %40 : vector<128x32xf32> to vector<1x128x32xf32>
    %43 = vector.shape_cast %41 : vector<128x32xf32> to vector<1x128x32xf32>
    %44 = tpu.concatenate %42, %43 in 0 : vector<1x128x32xf32>, vector<1x128x32xf32> -> vector<2x128x32xf32>
    %45 = arith.truncf %44 : vector<2x128x32xf32> to vector<2x128x32xbf16>
    %c0_17 = arith.constant 0 : index
    %c0_18 = arith.constant 0 : index
    %c0_19 = arith.constant 0 : index
    %c0_20 = arith.constant 0 : index
    %46 = vector.load %arg7[%c0_17, %c0_18, %c0_19, %c0_20] : memref<1x2x128x32xbf16, #tpu.memory_space<vmem>>, vector<1x2x128x32xbf16>
    %47 = vector.shape_cast %46 : vector<1x2x128x32xbf16> to vector<2x128x32xbf16>
    %48 = vector.shape_cast %45 : vector<2x128x32xbf16> to vector<1x2x128x32xbf16>
    tpu.vector_store %arg7[%c0_17, %c0_18, %c0_19, %c0_20], %48 {strides = array<i32>} : memref<1x2x128x32xbf16, #tpu.memory_space<vmem>>, vector<1x2x128x32xbf16>,
    %49 = vector.extract_strided_slice %28 {offsets = [0, 128], sizes = [128, 64], strides = [1, 1]} : vector<128x192xf32> to vector<128x64xf32>
    %50 = vector.extract_strided_slice %49 {offsets = [0, 0], sizes = [128, 32], strides = [1, 1]} : vector<128x64xf32> to vector<128x32xf32>
    %51 = vector.extract_strided_slice %49 {offsets = [0, 32], sizes = [128, 32], strides = [1, 1]} : vector<128x64xf32> to vector<128x32xf32>
    %52 = vector.shape_cast %50 : vector<128x32xf32> to vector<1x128x32xf32>
    %53 = vector.shape_cast %51 : vector<128x32xf32> to vector<1x128x32xf32>
    %54 = tpu.concatenate %52, %53 in 0 : vector<1x128x32xf32>, vector<1x128x32xf32> -> vector<2x128x32xf32>
    %55 = arith.truncf %54 : vector<2x128x32xf32> to vector<2x128x32xbf16>
    %c0_21 = arith.constant 0 : index
    %c0_22 = arith.constant 0 : index
    %c0_23 = arith.constant 0 : index
    %c0_24 = arith.constant 0 : index
    %56 = vector.load %arg8[%c0_21, %c0_22, %c0_23, %c0_24] : memref<1x2x128x32xbf16, #tpu.memory_space<vmem>>, vector<1x2x128x32xbf16>
    %57 = vector.shape_cast %56 : vector<1x2x128x32xbf16> to vector<2x128x32xbf16>
    %58 = vector.shape_cast %55 : vector<2x128x32xbf16> to vector<1x2x128x32xbf16>
    tpu.vector_store %arg8[%c0_21, %c0_22, %c0_23, %c0_24], %58 {strides = array<i32>} : memref<1x2x128x32xbf16, #tpu.memory_space<vmem>>, vector<1x2x128x32xbf16>,
    return
  }
  func.func @transform_0(%arg0: i32, %arg1: i32) -> (i32, i32, i32) {
    %c0_i32 = arith.constant 0 : i32
    %c0_i32_0 = arith.constant 0 : i32
    return %arg0, %arg1, %c0_i32 : i32, i32, i32
  }
  func.func @transform_1(%arg0: i32, %arg1: i32) -> (i32, i32) {
    %c0_i32 = arith.constant 0 : i32
    %c0_i32_0 = arith.constant 0 : i32
    %c0_i32_1 = arith.constant 0 : i32
    return %c0_i32, %c0_i32_0 : i32, i32
  }
  func.func @transform_2(%arg0: i32, %arg1: i32) -> (i32, i32) {
    %c0_i32 = arith.constant 0 : i32
    %c0_i32_0 = arith.constant 0 : i32
    %c0_i32_1 = arith.constant 0 : i32
    return %c0_i32, %c0_i32_0 : i32, i32
  }
  func.func @transform_3(%arg0: i32, %arg1: i32) -> (i32, i32) {
    %c0_i32 = arith.constant 0 : i32
    %c0_i32_0 = arith.constant 0 : i32
    %c0_i32_1 = arith.constant 0 : i32
    return %c0_i32, %c0_i32_0 : i32, i32
  }
  func.func @transform_4(%arg0: i32, %arg1: i32) -> (i32, i32, i32, i32) {
    %c0_i32 = arith.constant 0 : i32
    %c0_i32_0 = arith.constant 0 : i32
    %c0_i32_1 = arith.constant 0 : i32
    return %arg0, %c0_i32, %arg1, %c0_i32_0 : i32, i32, i32, i32
  }
  func.func @transform_5(%arg0: i32, %arg1: i32) -> (i32, i32, i32, i32) {
    %c0_i32 = arith.constant 0 : i32
    %c0_i32_0 = arith.constant 0 : i32
    %c0_i32_1 = arith.constant 0 : i32
    return %arg0, %c0_i32, %arg1, %c0_i32_0 : i32, i32, i32, i32
  }
  func.func @transform_6(%arg0: i32, %arg1: i32) -> (i32, i32, i32, i32) {
    %c0_i32 = arith.constant 0 : i32
    %c0_i32_0 = arith.constant 0 : i32
    %c0_i32_1 = arith.constant 0 : i32
    return %arg0, %c0_i32, %arg1, %c0_i32_0 : i32, i32, i32, i32
  }
}

</mosaic_0001>

<bundles_post_ra>
// kernel: tpu_custom_call.1
= control target key start
LH: loop header
LB: loop body
LE: loop exit
PB: predicated region body
PF: predicated region fallthrough
CT: control target
= control target key end

     0   :  { %s2459_s21 = smov 0   ;;  %s2461_s22 = smov 0   ;;  %s3169_s0 = inlined_call_operand.vmem [shape: f32[2,256,64], index: 0, kind: input, shape index: {}]   ;;  %s3170_s1 = inlined_call_operand.vmem [shape: f32[1,64], index: 1, kind: input, shape index: {}]   ;;  %s3171_s2 = inlined_call_operand.vmem [shape: f32[1,64], index: 2, kind: input, shape index: {}]   ;;  %s3172_s3 = inlined_call_operand.vmem [shape: bf16[64,192], index: 3, kind: input, shape index: {}]   ;;  %s3173_s4 = inlined_call_operand.vmem [shape: bf16[2,2,256,32], index: 4, kind: output, shape index: {0}]   ;;  %s3174_s5 = inlined_call_operand.vmem [shape: bf16[2,2,256,32], index: 5, kind: output, shape index: {1}]   ;;  %s3175_s6 = inlined_call_operand.vmem [shape: bf16[2,2,256,32], index: 6, kind: output, shape index: {2}]  }
   0x1   :  { %s2463_s23 = smov 0   ;;  %s2465_s24 = smov 0  }
   0x2   :  { %s2467_s25 = smov 0   ;;  %s2469_s26 = smov 0  }
   0x3   :  { %s2471_s27 = smov 0  }
   0x4 LB: > { %s26_s28 = sadd.s32 1, %s2411_s25  ;;  %s29_s29 = sadd.s32 1, %s2415_s26  ;;  %s2419_s27 = sphi %s2471_s27, %s17_s27   ;;  %s2415_s26 = sphi %s2469_s26, %s3182_s26   ;;  %s2411_s25 = sphi %s2467_s25, %s3181_s25   ;;  %s2407_s24 = sphi %s2465_s24, %s3180_s24   ;;  %s2403_s23 = sphi %s2463_s23, %s3179_s23   ;;  %s2399_s22 = sphi %s2461_s22, %s3178_s22   ;;  %s2395_s21 = sphi %s2459_s21, %s3177_s21  }
   0x5   : > { %p27_p0 = scmp.ge.s32.totalorder %s26_s28, 2  ;;  %s2003_s30 = sadd.s32 4294967295, %s2419_s27  }
   0x6   : > { %p139_p1 = scmp.ne.s32.totalorder %s2399_s22, %s2395_s21  ;;  %p140_p2 = scmp.eq.s32.totalorder %s2003_s30, 3 }
   0x7   : > { %s3184_s28 = smov (%p27_p0, %s26_s28), 0  ;;  %s3186_s29 = smov (!%p27_p0, %s29_s29), %s2415_s26 }
   0x8   : > { %s125_s7 = ssub.s32 %s2411_s25, %s3184_s28  ;;  %p31_p3 = scmp.ge.s32.totalorder %s3186_s29, 2 }
   0x9   : > { %p2007_p4 = scmp.ge.s32.totalorder %s2419_s27, 1  ;;  %p2503_p5 = por %p140_p2, %p139_p1 }
   0xa   : > { %p242_p6 = scmp.lt.s32.totalorder %s2419_s27, 5  ;;  %s3188_s29 = smov (%p31_p3, %s3186_s29), 0 }
   0xb   : > { %s124_s9 = ssub.s32 %s2415_s26, %s3188_s29  ;;  %s129_s11 = sadd.s32 1, %s2399_s22 }
   0xc   : > { %p243_p7 = pnand %p2007_p4, %p242_p6  ;;  %s126_s10 = sor.u32 %s125_s7, %s124_s9 }
   0xd   : > { %p127_p8 = scmp.eq.s32.totalorder %s126_s10, 0  ;;  %s2516_s13 = sshll.u32 (!%p243_p7), %s2403_s23, 4 }
   0xe   : > { %246 = sbr.rel (%p243_p7) target bundleno = 835 (0x343), region = 36  ;;  %p284_p9 = scmp.lt.s32.totalorder (!%p243_p7), %s2407_s24, 1 }
   0xf   : > { %s2514_s12 = scalar_select %p127_p8, %s2399_s22, %s129_s11  }
  0x10   : > { %p286_p10 = scmp.lt.s32.totalorder (!%p243_p7), %s2516_s13, 31  ;;  %s2423_s20 = smov (!%p243_p7), 96  }
  0x13   : > { %s285_s14 = scalar_select %p284_p9, %s2407_s24, 1  ;;  %vm315_vm0 = vcmask 523264   ;;  %vm954_vm1 = vcmask 257024  }
  0x14   : > { %s287_s15 = scalar_select %p286_p10, %s2516_s13, 31 }
  0x15   : > { %s2012_s16 = sshll.u32 %s285_s14, 5  ;;  %s2100_s23 = sshll.u32 (%p2503_p5), %s2407_s24, 6 }
  0x16   : > { %s289_s17 = sadd.s32 %s2012_s16, %s287_s15  ;;  %s268_s16 = sand.u32 1, %s2395_s21  }
  0x17   : > { %s2013_s18 = sshll.u32 %s289_s17, 3  ;;  %s2778_s17 = sshll.u32 %s268_s16, 7 }
  0x18   : > { %s2525_s30 = scalar_lea.vmem %s3169_s0, %s2013_s18  ;;  %s2783_s18 = scalar_lea.vmem [#allocation2], %s2778_s17 }
  0x19   : > { %v297_v0 = vld [vmem:[%s2525_s30] sm:$0xff]  ;;  %v298_v2 = vld [vmem:[%s2525_s30 + $0x8] sm:$0xff]  ;;  %v299_v8 = vld [vmem:[%s2525_s30 + $0x10] sm:$0xff]  ;;  %s2422_s21 = smov 64   ;;  %s2791_s19 = scalar_lea.vmem [#allocation4], %s2778_s17 }
  0x1a   : > { %v305_v1 = vld [vmem:[%s2525_s30 + $0x40] sm:$0xff]  ;;  %v316_v3 = vsel %vm315_vm0, %v297_v0, 0.0  ;;  %v306_v5 = vld [vmem:[%s2525_s30 + $0x48] sm:$0xff]  ;;  %v319_v6 = vsel %vm315_vm0, %v298_v2, 0.0  ;;  %v300_v9 = vld [vmem:[%s2525_s30 + $0x18] sm:$0xff]  ;;  %v322_v10 = vsel %vm315_vm0, %v299_v8, 0.0  ;;  %s1356_s7 = sadd.s32 (%p2503_p5), %s2100_s23, %s2516_s13 }
  0x1b   : > { %v340_v4 = vsel %vm315_vm0, %v305_v1, 0.0  ;;  %317 = vadd.xlane.f32.xlu0 %v316_v3  ;;  %v343_v7 = vsel %vm315_vm0, %v306_v5, 0.0  ;;  %v325_v11 = vsel %vm315_vm0, %v300_v9, 0.0  ;;  %v2540_v12 = vld [vmem:[%s2525_s30 + $0x50] sm:$0xff]  ;;  %v2543_v13 = vld [vmem:[%s2525_s30 + $0x58] sm:$0xff]  ;;  %v2550_v16 = vld [vmem:[%s2525_s30 + $0x20] sm:$0xff] }
  0x1c   : > { %341 = vadd.xlane.f32.xlu1 %v340_v4  ;;  %v346_v14 = vsel %vm315_vm0, %v2540_v12, 0.0  ;;  %v349_v15 = vsel %vm315_vm0, %v2543_v13, 0.0  ;;  %v2553_v17 = vld [vmem:[%s2525_s30 + $0x28] sm:$0xff]  ;;  %v328_v18 = vsel %vm315_vm0, %v2550_v16, 0.0  ;;  %v2560_v20 = vld [vmem:[%s2525_s30 + $0x60] sm:$0xff]  ;;  %v2570_v24 = vld [vmem:[%s2525_s30 + $0x30] sm:$0xff] }
  0x1d   : > { %v331_v19 = vsel %vm315_vm0, %v2553_v17, 0.0  ;;  %v2563_v21 = vld [vmem:[%s2525_s30 + $0x68] sm:$0xff]  ;;  %v352_v22 = vsel %vm315_vm0, %v2560_v20, 0.0  ;;  %v2573_v25 = vld [vmem:[%s2525_s30 + $0x38] sm:$0xff]  ;;  %v334_v26 = vsel %vm315_vm0, %v2570_v24, 0.0  ;;  %v2580_v28 = vld [vmem:[%s2525_s30 + $0x70] sm:$0xff] }
  0x1e   : > { %v355_v23 = vsel %vm315_vm0, %v2563_v21, 0.0  ;;  %v337_v27 = vsel %vm315_vm0, %v2573_v25, 0.0  ;;  %v2583_v29 = vld [vmem:[%s2525_s30 + $0x78] sm:$0xff]  ;;  %v358_v30 = vsel %vm315_vm0, %v2580_v28, 0.0  ;;  %s2933_s30 = scalar_lea.vmem [#allocation3], %s2778_s17  ;;  %s2101_s9 = sshll.u32 (%p2503_p5), %s1356_s7, 2 }
  0x1f   : > { %320 = vadd.xlane.f32.xlu0 %v319_v6  ;;  %v361_v31 = vsel %vm315_vm0, %v2583_v29, 0.0  ;;  %s1358_s14 = scalar_lea.vmem (%p2503_p5), %s3173_s4, %s2101_s9 }
  0x20   : > { %344 = vadd.xlane.f32.xlu1 %v343_v7 }
  0x23   : > { %323 = vadd.xlane.f32.xlu0 %v322_v10 }
  0x24   : > { %326 = vadd.xlane.f32.xlu1 %v325_v11 }
  0x27   : > { %347 = vadd.xlane.f32.xlu0 %v346_v14 }
  0x28   : > { %350 = vadd.xlane.f32.xlu1 %v349_v15 }
  0x2b   : > { %329 = vadd.xlane.f32.xlu0 %v328_v18 }
  0x2c   : > { %332 = vadd.xlane.f32.xlu1 %v331_v19 }
  0x2f   : > { %353 = vadd.xlane.f32.xlu0 %v352_v22 }
  0x30   : > { %356 = vadd.xlane.f32.xlu1 %v355_v23 }
  0x33   : > { %335 = vadd.xlane.f32.xlu0 %v334_v26 }
  0x34   : > { %338 = vadd.xlane.f32.xlu1 %v337_v27 }
  0x37   : > { %359 = vadd.xlane.f32.xlu0 %v358_v30 }
  0x38   : > { %362 = vadd.xlane.f32.xlu1 %v361_v31 }
  0xa4   : > { %v318_v32 = vpop.xlane.xlu0 %317 }
  0xa5   : > { %v342_v33 = vpop.xlane.xlu1 %341  ;;  %v365_v34 = vmul.f32 0.015625, %v318_v32 }
  0xa6   : > { %v373_v35 = vmul.f32 0.015625, %v342_v33 }
  0xa7   : > { %v2589_v36 = vsub.f32 %v297_v0, %v365_v34 }
  0xa8   : > { %v2591_v37 = vsub.f32 %v305_v1, %v373_v35  ;;  %v321_v38 = vpop.xlane.xlu0 %320 }
  0xa9   : > { %v345_v39 = vpop.xlane.xlu1 %344  ;;  %v366_v40 = vmul.f32 0.015625, %v321_v38  ;;  %v397_v42 = vmul.f32 %v2589_v36, %v2589_v36 }
  0xaa   : > { %v374_v41 = vmul.f32 0.015625, %v345_v39  ;;  %v405_v43 = vmul.f32 %v2591_v37, %v2591_v37 }
  0xab   : > { %v2597_v44 = vsub.f32 %v298_v2, %v366_v40  ;;  %v413_v46 = vsel %vm315_vm0, %v397_v42, 0.0 }
  0xac   : > { %v2599_v45 = vsub.f32 %v306_v5, %v374_v41  ;;  %414 = vadd.xlane.f32.xlu0 %v413_v46  ;;  %v324_v47 = vpop.xlane.xlu0 %323  ;;  %v437_v49 = vsel %vm315_vm0, %v405_v43, 0.0 }
  0xad   : > { %v327_v48 = vpop.xlane.xlu1 %326  ;;  %v367_v50 = vmul.f32 0.015625, %v324_v47  ;;  %v398_v52 = vmul.f32 %v2597_v44, %v2597_v44 }
  0xae   : > { %v368_v51 = vmul.f32 0.015625, %v327_v48  ;;  %v406_v53 = vmul.f32 %v2599_v45, %v2599_v45 }
  0xaf   : > { %v2607_v54 = vsub.f32 %v299_v8, %v367_v50  ;;  %v416_v56 = vsel %vm315_vm0, %v398_v52, 0.0  ;;  %v2323_v50 = vld [vmem:[%s3172_s3 + $0x30] ss:$8 sps:$4 sm:$0xff]  }
  0xb0   : > { %v2609_v55 = vsub.f32 %v300_v9, %v368_v51  ;;  %438 = vadd.xlane.f32.xlu0 %v437_v49  ;;  %417 = vadd.xlane.f32.xlu1 %v416_v56  ;;  %v348_v57 = vpop.xlane.xlu0 %347  ;;  %v440_v59 = vsel %vm315_vm0, %v406_v53, 0.0  ;;  %v2321_v49 = vld [vmem:[%s3172_s3 + $0x34] ss:$8 sps:$4 sm:$0xff]   ;;  %v2324_v53 = vld [vmem:[%s3172_s3 + $0x24] ss:$8 sps:$4 sm:$0xff]  }
  0xb1   : > { %v351_v58 = vpop.xlane.xlu1 %350  ;;  %v375_v60 = vmul.f32 0.015625, %v348_v57  ;;  %v399_v62 = vmul.f32 %v2607_v54, %v2607_v54  ;;  %657 = vmatprep.subr.bf16.mxu0 %v2321_v49  ;;  %2174 = vmatprep.subr.bf16.mxu1 %v2321_v49  ;;  %v2326_v56 = vld [vmem:[%s3172_s3 + $0x20] ss:$8 sps:$4 sm:$0xff]  }
  0xb2   : > { %v376_v61 = vmul.f32 0.015625, %v351_v58  ;;  %v400_v63 = vmul.f32 %v2609_v55, %v2609_v55  ;;  %658 = vmatpush1.bf16.msra.mxu0 %v2323_v50  ;;  %2178 = vmatpush1.bf16.msra.mxu1 %v2323_v50  ;;  %v2327_v58 = vld [vmem:[%s3172_s3 + $0x14] ss:$8 sps:$4 sm:$0xff]  }
  0xb3   : > { %v2618_v0 = vsub.f32 %v2540_v12, %v375_v60  ;;  %v419_v2 = vsel %vm315_vm0, %v399_v62, 0.0  ;;  %659 = vmatprep.subr.bf16.mxu0 %v2324_v53  ;;  %2175 = vmatprep.subr.bf16.mxu1 %v2324_v53  ;;  %v2330_v60 = vld [vmem:[%s3172_s3 + $0x4] ss:$8 sps:$4 sm:$0xff]   ;;  %v2421_v62 = vmov 0  }
  0xb4   : > { %v2621_v1 = vsub.f32 %v2543_v13, %v376_v61  ;;  %441 = vadd.xlane.f32.xlu1 %v440_v59  ;;  %420 = vadd.xlane.f32.xlu0 %v419_v2  ;;  %v330_v3 = vpop.xlane.xlu0 %329  ;;  %v422_v5 = vsel %vm315_vm0, %v400_v63, 0.0  ;;  %v2329_v59 = vld [vmem:[%s3172_s3 + $0x10] ss:$8 sps:$4 sm:$0xff]   ;;  %v2332_v61 = vld [vmem:[%s3172_s3] ss:$8 sps:$4 sm:$0xff]  }
  0xb5   : > { %v333_v4 = vpop.xlane.xlu1 %332  ;;  %v369_v6 = vmul.f32 0.015625, %v330_v3  ;;  %v407_v8 = vmul.f32 %v2618_v0, %v2618_v0  ;;  %681 = vmatprep.mubr.bf16.mxu0 %v2421_v62  ;;  %721 = vmatprep.mubr.bf16.mxu1 %v2421_v62 }
  0xb6   : > { %v370_v7 = vmul.f32 0.015625, %v333_v4  ;;  %v408_v9 = vmul.f32 %v2621_v1, %v2621_v1  ;;  %660 = vmatpush1.bf16.msra.mxu0 %v2326_v56  ;;  %2179 = vmatpush1.bf16.msra.mxu1 %v2326_v56 }
  0xb7   : > { %v2630_v10 = vsub.f32 %v2550_v16, %v369_v6  ;;  %v443_v12 = vsel %vm315_vm0, %v407_v8, 0.0  ;;  %661 = vmatprep.subr.bf16.mxu0 %v2327_v58  ;;  %2176 = vmatprep.subr.bf16.mxu1 %v2327_v58 }
  0xb8   : > { %v2633_v11 = vsub.f32 %v2553_v17, %v370_v7  ;;  %423 = vadd.xlane.f32.xlu1 %v422_v5  ;;  %444 = vadd.xlane.f32.xlu0 %v443_v12  ;;  %v354_v13 = vpop.xlane.xlu0 %353  ;;  %v446_v15 = vsel %vm315_vm0, %v408_v9, 0.0 }
  0xb9   : > { %v357_v14 = vpop.xlane.xlu1 %356  ;;  %v377_v18 = vmul.f32 0.015625, %v354_v13  ;;  %v401_v22 = vmul.f32 %v2630_v10, %v2630_v10 }
  0xba   : > { %v378_v19 = vmul.f32 0.015625, %v357_v14  ;;  %v402_v16 = vmul.f32 %v2633_v11, %v2633_v11  ;;  %662 = vmatpush1.bf16.msra.mxu0 %v2329_v59  ;;  %2180 = vmatpush1.bf16.msra.mxu1 %v2329_v59 }
  0xbb   : > { %v2642_v23 = vsub.f32 %v2560_v20, %v377_v18  ;;  %v425_v26 = vsel %vm315_vm0, %v401_v22, 0.0  ;;  %663 = vmatprep.subr.bf16.mxu0 %v2330_v60  ;;  %2177 = vmatprep.subr.bf16.mxu1 %v2330_v60 }
  0xbc   : > { %v2645_v17 = vsub.f32 %v2563_v21, %v378_v19  ;;  %447 = vadd.xlane.f32.xlu1 %v446_v15  ;;  %426 = vadd.xlane.f32.xlu0 %v425_v26  ;;  %v336_v27 = vpop.xlane.xlu0 %335  ;;  %v428_v31 = vsel %vm315_vm0, %v402_v16, 0.0 }
  0xbd   : > { %v339_v30 = vpop.xlane.xlu1 %338  ;;  %v371_v32 = vmul.f32 0.015625, %v336_v27  ;;  %v409_v34 = vmul.f32 %v2642_v23, %v2642_v23 }
  0xbe   : > { %v372_v33 = vmul.f32 0.015625, %v339_v30  ;;  %v410_v20 = vmul.f32 %v2645_v17, %v2645_v17  ;;  %664 = vmatpush1.bf16.msra.mxu0 %v2332_v61  ;;  %2181 = vmatpush1.bf16.msra.mxu1 %v2332_v61 }
  0xbf   : > { %v2654_v35 = vsub.f32 %v2570_v24, %v371_v32  ;;  %v449_v38 = vsel %vm315_vm0, %v409_v34, 0.0 }
  0xc0   : > { %v2657_v21 = vsub.f32 %v2573_v25, %v372_v33  ;;  %429 = vadd.xlane.f32.xlu1 %v428_v31  ;;  %450 = vadd.xlane.f32.xlu0 %v449_v38  ;;  %v360_v39 = vpop.xlane.xlu0 %359  ;;  %v452_v41 = vsel %vm315_vm0, %v410_v20, 0.0 }
  0xc1   : > { %v363_v40 = vpop.xlane.xlu1 %362  ;;  %v379_v42 = vmul.f32 0.015625, %v360_v39  ;;  %v403_v46 = vmul.f32 %v2654_v35, %v2654_v35 }
  0xc2   : > { %v380_v43 = vmul.f32 0.015625, %v363_v40  ;;  %v404_v24 = vmul.f32 %v2657_v21, %v2657_v21 }
  0xc3   : > { %v2666_v47 = vsub.f32 %v2580_v28, %v379_v42  ;;  %v431_v48 = vsel %vm315_vm0, %v403_v46, 0.0 }
  0xc4   : > { %v2669_v25 = vsub.f32 %v2583_v29, %v380_v43  ;;  %453 = vadd.xlane.f32.xlu1 %v452_v41  ;;  %432 = vadd.xlane.f32.xlu0 %v431_v48  ;;  %v434_v51 = vsel %vm315_vm0, %v404_v24, 0.0  ;;  %v2708_v41 = vld [vmem:[%s3170_s1] ss:$0 sm:$0xff] }
  0xc5   : > { %v411_v28 = vmul.f32 %v2666_v47, %v2666_v47 }
  0xc6   : > { %v412_v29 = vmul.f32 %v2669_v25, %v2669_v25 }
  0xc7   : > { %v455_v52 = vsel %vm315_vm0, %v411_v28, 0.0 }
  0xc8   : > { %435 = vadd.xlane.f32.xlu1 %v434_v51  ;;  %456 = vadd.xlane.f32.xlu0 %v455_v52  ;;  %v458_v57 = vsel %vm315_vm0, %v412_v29, 0.0  ;;  %v2715_v52 = vld [vmem:[%s3171_s2] ss:$0 sm:$0xff] }
  0xcc   : > { %459 = vadd.xlane.f32.xlu1 %v458_v57 }
 0x135   : > { %v415_v63 = vpop.xlane.xlu0 %414 }
 0x136   : > { %v461_v2 = vmul.f32 0.015625, %v415_v63 }
 0x138   : > { %v477_v3 = vadd.f32 1e-05, %v461_v2 }
 0x139   : > { %v418_v4 = vpop.xlane.xlu1 %417  ;;  %v439_v5 = vpop.xlane.xlu0 %438 }
 0x13a   : > { %2333 = vrsqrt.f32 %v477_v3  ;;  %v462_v6 = vmul.f32 0.015625, %v418_v4  ;;  %v469_v7 = vmul.f32 0.015625, %v439_v5 }
 0x13c   : > { %v478_v8 = vadd.f32 1e-05, %v462_v6  ;;  %v485_v9 = vadd.f32 1e-05, %v469_v7 }
 0x13d   : > { %v442_v12 = vpop.xlane.xlu1 %441  ;;  %v421_v13 = vpop.xlane.xlu0 %420 }
 0x13e   : > { %2335 = vrsqrt.f32 %v478_v8  ;;  %v470_v14 = vmul.f32 0.015625, %v442_v12  ;;  %v463_v15 = vmul.f32 0.015625, %v421_v13 }
 0x13f   : > { %2337 = vrsqrt.f32 %v485_v9 }
 0x140   : > { %v486_v18 = vadd.f32 1e-05, %v470_v14  ;;  %v479_v19 = vadd.f32 1e-05, %v463_v15 }
 0x141   : > { %v424_v22 = vpop.xlane.xlu1 %423  ;;  %v445_v16 = vpop.xlane.xlu0 %444 }
 0x142   : > { %2339 = vrsqrt.f32 %v486_v18  ;;  %v464_v26 = vmul.f32 0.015625, %v424_v22  ;;  %v471_v27 = vmul.f32 0.015625, %v445_v16 }
 0x143   : > { %2341 = vrsqrt.f32 %v479_v19 }
 0x144   : > { %v480_v30 = vadd.f32 1e-05, %v464_v26  ;;  %v487_v31 = vadd.f32 1e-05, %v471_v27 }
 0x145   : > { %v448_v32 = vpop.xlane.xlu1 %447  ;;  %v427_v33 = vpop.xlane.xlu0 %426 }
 0x146   : > { %2343 = vrsqrt.f32 %v480_v30  ;;  %v472_v34 = vmul.f32 0.015625, %v448_v32  ;;  %v465_v20 = vmul.f32 0.015625, %v427_v33 }
 0x147   : > { %v2334_v38 = vpop.eup %2333  ;;  %2345 = vrsqrt.f32 %v487_v31 }
 0x148   : > { %v488_v39 = vadd.f32 1e-05, %v472_v34  ;;  %v481_v40 = vadd.f32 1e-05, %v465_v20  ;;  %v509_v42 = vmul.f32 %v2334_v38, %v2589_v36 }
 0x149   : > { %v430_v43 = vpop.xlane.xlu1 %429  ;;  %v451_v46 = vpop.xlane.xlu0 %450 }
 0x14a   : > { %2347 = vrsqrt.f32 %v488_v39  ;;  %v466_v24 = vmul.f32 0.015625, %v430_v43  ;;  %v473_v48 = vmul.f32 0.015625, %v451_v46  ;;  %v531_v50 = vmul.f32 %v2708_v41, %v509_v42 }
 0x14b   : > { %v2336_v49 = vpop.eup %2335  ;;  %2349 = vrsqrt.f32 %v481_v40 }
 0x14c   : > { %v2338_v51 = vpop.eup %2337  ;;  %v482_v28 = vadd.f32 1e-05, %v466_v24  ;;  %v489_v29 = vadd.f32 1e-05, %v473_v48  ;;  %v510_v53 = vmul.f32 %v2336_v49, %v2597_v44  ;;  %v553_v63 = vadd.f32 %v2715_v52, %v531_v50 }
 0x14d   : > { %v454_v36 = vpop.xlane.xlu1 %453  ;;  %v433_v56 = vpop.xlane.xlu0 %432  ;;  %v517_v57 = vmul.f32 %v2338_v51, %v2591_v37 }
 0x14e   : > { %2351 = vrsqrt.f32 %v482_v28  ;;  %v474_v58 = vmul.f32 0.015625, %v454_v36  ;;  %v467_v59 = vmul.f32 0.015625, %v433_v56  ;;  %v532_v60 = vmul.f32 %v2708_v41, %v510_v53 }
 0x14f   : > { %v2340_v61 = vpop.eup %2339  ;;  %2353 = vrsqrt.f32 %v489_v29  ;;  %v539_v37 = vmul.f32 %v2708_v41, %v517_v57 }
 0x150   : > { %v2342_v2 = vpop.eup %2341  ;;  %v490_v3 = vadd.f32 1e-05, %v474_v58  ;;  %v483_v4 = vadd.f32 1e-05, %v467_v59  ;;  %v554_v5 = vadd.f32 %v2715_v52, %v532_v60  ;;  %v518_v44 = vmul.f32 %v2340_v61, %v2599_v45 }
 0x151   : > { %v436_v6 = vpop.xlane.xlu1 %435  ;;  %v457_v7 = vpop.xlane.xlu0 %456  ;;  %v511_v8 = vmul.f32 %v2342_v2, %v2607_v54  ;;  %v561_v54 = vadd.f32 %v2715_v52, %v539_v37 }
 0x152   : > { %2355 = vrsqrt.f32 %v490_v3  ;;  %v468_v9 = vmul.f32 0.015625, %v436_v6  ;;  %v475_v12 = vmul.f32 0.015625, %v457_v7  ;;  %v569_v13 = vpack.c.bf16 %v554_v5, %v553_v63 }
 0x153   : > { %v2344_v14 = vpop.eup %2343  ;;  %2357 = vrsqrt.f32 %v483_v4  ;;  %v540_v15 = vmul.f32 %v2708_v41, %v518_v44  ;;  %v533_v18 = vmul.f32 %v2708_v41, %v511_v8 }
 0x154   : > { %v2346_v19 = vpop.eup %2345  ;;  %v484_v22 = vadd.f32 1e-05, %v468_v9  ;;  %v491_v16 = vadd.f32 1e-05, %v475_v12  ;;  %2024 = vmatmul.mubr.msk.bf16.vlgmr.msra.gmra.mxu0 %vm315_vm0, %v569_v13  ;;  %v512_v45 = vmul.f32 %v2344_v14, %v2609_v55 }
 0x155   : > { %v460_v26 = vpop.xlane.xlu1 %459  ;;  %v562_v27 = vadd.f32 %v2715_v52, %v540_v15  ;;  %691 = vmatprep.mubr.bf16.mxu0 %v2421_v62  ;;  %v519_v30 = vmul.f32 %v2346_v19, %v2618_v0  ;;  %v555_v20 = vadd.f32 %v2715_v52, %v533_v18 }
 0x156   : > { %2359 = vrsqrt.f32 %v484_v22  ;;  %v476_v31 = vmul.f32 0.015625, %v460_v26  ;;  %v534_v32 = vmul.f32 %v2708_v41, %v512_v45 }
 0x157   : > { %v2348_v33 = vpop.eup %2347  ;;  %2361 = vrsqrt.f32 %v491_v16  ;;  %v573_v34 = vpack.c.bf16 %v562_v27, %v561_v54  ;;  %v541_v42 = vmul.f32 %v2708_v41, %v519_v30 }
 0x158   : > { %v2350_v38 = vpop.eup %2349  ;;  %v492_v55 = vadd.f32 1e-05, %v476_v31  ;;  %v556_v39 = vadd.f32 %v2715_v52, %v534_v32  ;;  %v520_v40 = vmul.f32 %v2348_v33, %v2621_v1 }
 0x159   : > { %2028 = vmatmul.mubr.msk.bf16.vlgmr.msra.gmra.mxu1 %vm315_vm0, %v573_v34  ;;  %v513_v0 = vmul.f32 %v2350_v38, %v2630_v10  ;;  %v563_v49 = vadd.f32 %v2715_v52, %v541_v42 }
 0x15a   : > { %2363 = vrsqrt.f32 %v492_v55  ;;  %v570_v43 = vpack.c.bf16 %v556_v39, %v555_v20  ;;  %731 = vmatprep.mubr.bf16.mxu1 %v2421_v62  ;;  %v542_v46 = vmul.f32 %v2708_v41, %v520_v40 }
 0x15b   : > { %v2352_v24 = vpop.eup %2351  ;;  %v535_v51 = vmul.f32 %v2708_v41, %v513_v0 }
 0x15c   : > { %v2354_v48 = vpop.eup %2353  ;;  %2025 = vmatmul.mubr.msk.bf16.gmra.mxu0 %vm315_vm0, %v570_v43  ;;  %v564_v1 = vadd.f32 %v2715_v52, %v542_v46  ;;  %v514_v50 = vmul.f32 %v2352_v24, %v2633_v11 }
 0x15d   : > { %701 = vmatprep.mubr.bf16.mxu0 %v2421_v62  ;;  %v521_v10 = vmul.f32 %v2354_v48, %v2642_v23  ;;  %v557_v56 = vadd.f32 %v2715_v52, %v535_v51 }
 0x15e   : > { %v574_v28 = vpack.c.bf16 %v564_v1, %v563_v49  ;;  %v536_v29 = vmul.f32 %v2708_v41, %v514_v50 }
 0x15f   : > { %v2356_v53 = vpop.eup %2355  ;;  %v543_v59 = vmul.f32 %v2708_v41, %v521_v10 }
 0x160   : > { %v2358_v36 = vpop.eup %2357  ;;  %v558_v57 = vadd.f32 %v2715_v52, %v536_v29  ;;  %v522_v58 = vmul.f32 %v2356_v53, %v2645_v17 }
 0x161   : > { %2029 = vmatmul.mubr.msk.bf16.gmra.mxu1 %vm315_vm0, %v574_v28  ;;  %v515_v11 = vmul.f32 %v2358_v36, %v2654_v35  ;;  %v565_v2 = vadd.f32 %v2715_v52, %v543_v59 }
 0x162   : > { %v571_v60 = vpack.c.bf16 %v558_v57, %v557_v56  ;;  %741 = vmatprep.mubr.bf16.mxu1 %v2421_v62  ;;  %v544_v23 = vmul.f32 %v2708_v41, %v522_v58 }
 0x163   : > { %v2360_v61 = vpop.eup %2359  ;;  %v537_v4 = vmul.f32 %v2708_v41, %v515_v11 }
 0x164   : > { %v2362_v63 = vpop.eup %2361  ;;  %2026 = vmatmul.mubr.msk.bf16.gmra.mxu0 %vm315_vm0, %v571_v60  ;;  %v566_v3 = vadd.f32 %v2715_v52, %v544_v23  ;;  %v516_v17 = vmul.f32 %v2360_v61, %v2657_v21 }
 0x165   : > { %711 = vmatprep.mubr.bf16.mxu0 %v2421_v62  ;;  %v523_v35 = vmul.f32 %v2362_v63, %v2666_v47  ;;  %v559_v7 = vadd.f32 %v2715_v52, %v537_v4 }
 0x166   : > { %v575_v5 = vpack.c.bf16 %v566_v3, %v565_v2  ;;  %v538_v44 = vmul.f32 %v2708_v41, %v516_v17 }
 0x167   : > { %v2364_v6 = vpop.eup %2363  ;;  %v545_v9 = vmul.f32 %v2708_v41, %v523_v35 }
 0x168   : > { %v560_v37 = vadd.f32 %v2715_v52, %v538_v44  ;;  %v524_v8 = vmul.f32 %v2364_v6, %v2669_v25 }
 0x169   : > { %2030 = vmatmul.mubr.msk.bf16.gmra.mxu1 %vm315_vm0, %v575_v5  ;;  %v567_v12 = vadd.f32 %v2715_v52, %v545_v9 }
 0x16a   : > { %v572_v21 = vpack.c.bf16 %v560_v37, %v559_v7  ;;  %751 = vmatprep.mubr.bf16.mxu1 %v2421_v62  ;;  %v546_v47 = vmul.f32 %v2708_v41, %v524_v8 }
 0x16c   : > { %2027 = vmatmul.mubr.msk.bf16.gmra.mxu0 %vm315_vm0, %v572_v21  ;;  %v568_v13 = vadd.f32 %v2715_v52, %v546_v47 }
 0x16e   : > { %v576_v14 = vpack.c.bf16 %v568_v13, %v567_v12 }
 0x171   : > { %2031 = vmatmul.mubr.msk.bf16.gmra.mxu1 %vm315_vm0, %v576_v14 }
 0x214   : > { %v683_v25 = vpop.f32.mrf.mxu0 }
 0x215   : > { %v2110_v15 = vpack.c.bf16 %v683_v25, %v683_v25 }
 0x216   : > { %v2780_v62 = vpop.f32.mrf.mxu0 }
 0x217   : > { %955 = vst.msk [vmem:[%s2783_s18] sm:$0xf] %vm954_vm1, %v2110_v15  ;;  %v2142_v41 = vpack.c.bf16 %v2780_v62, %v2780_v62  ;;  %987 = vrot.lane.b32.xlu0 %v2110_v15, %s2422_s21 }
 0x218   : > { %v687_v52 = vpop.f32.mrf.mxu0 }
 0x219   : > { %1307 = vst.msk [vmem:[%s2791_s19] sm:$0xf] %vm954_vm1, %v2142_v41  ;;  %v2111_v18 = vpack.c.bf16 %v687_v52, %v687_v52  ;;  %v723_v19 = vpop.f32.mrf.mxu1  ;;  %v2241_v32 = vpack.i.bf16 %v687_v52, %v683_v25 }
 0x21a   : > { %v2118_v22 = vpack.c.bf16 %v723_v19, %v723_v19  ;;  %v2795_v16 = vpop.f32.mrf.mxu0 }
 0x21b   : > { %956 = vst.msk [vmem:[%s2783_s18 + $0x4] sm:$0xf] %vm954_vm1, %v2111_v18  ;;  %v2143_v45 = vpack.c.bf16 %v2795_v16, %v2795_v16  ;;  %v2801_v26 = vpop.f32.mrf.mxu1  ;;  %989 = vrot.lane.b32.xlu1 %v2111_v18, %s2422_s21 }
 0x21c   : > { %963 = vst.msk [vmem:[%s2783_s18 + $0x20] sm:$0xf] %vm954_vm1, %v2118_v22  ;;  %v2150_v54 = vpack.c.bf16 %v2801_v26, %v2801_v26  ;;  %1003 = vrot.lane.b32.xlu0 %v2118_v22, %s2422_s21  ;;  %v693_v27 = vpop.f32.mrf.mxu0 }
 0x21d   : > { %1308 = vst.msk [vmem:[%s2791_s19 + $0x4] sm:$0xf] %vm954_vm1, %v2143_v45  ;;  %v2112_v30 = vpack.c.bf16 %v693_v27, %v693_v27  ;;  %v727_v31 = vpop.f32.mrf.mxu1 }
 0x21e   : > { %1315 = vst.msk [vmem:[%s2791_s19 + $0x20] sm:$0xf] %vm954_vm1, %v2150_v54  ;;  %v2119_v33 = vpack.c.bf16 %v727_v31, %v727_v31  ;;  %v2813_v34 = vpop.f32.mrf.mxu0  ;;  %v2246_v43 = vpack.i.bf16 %v727_v31, %v723_v19  ;;  %v2281_v54 = vpack.i.bf16 %v2795_v16, %v2780_v62 }
 0x21f   : > { %957 = vst.msk [vmem:[%s2783_s18 + $0x8] sm:$0xf] %vm954_vm1, %v2112_v30  ;;  %v2144_v20 = vpack.c.bf16 %v2813_v34, %v2813_v34  ;;  %v2819_v38 = vpop.f32.mrf.mxu1 }
 0x220   : > { %964 = vst.msk [vmem:[%s2783_s18 + $0x24] sm:$0xf] %vm954_vm1, %v2119_v33  ;;  %v2151_v55 = vpack.c.bf16 %v2819_v38, %v2819_v38  ;;  %2242 = vrot.lane.b32.xlu0 %v2241_v32, %s2423_s20  ;;  %1005 = vrot.lane.b32.xlu1 %v2119_v33, %s2422_s21  ;;  %v697_v39 = vpop.f32.mrf.mxu0  ;;  %v2296_v31 = vpack.i.bf16 %v2819_v38, %v2801_v26 }
 0x221   : > { %1309 = vst.msk [vmem:[%s2791_s19 + $0x8] sm:$0xf] %vm954_vm1, %v2144_v20  ;;  %v2251_v40 = vpack.i.bf16 %v697_v39, %v693_v27  ;;  %v2113_v42 = vpack.c.bf16 %v697_v39, %v697_v39  ;;  %v733_v0 = vpop.f32.mrf.mxu1 }
 0x222   : > { %1316 = vst.msk [vmem:[%s2791_s19 + $0x24] sm:$0xf] %vm954_vm1, %v2151_v55  ;;  %v2120_v46 = vpack.c.bf16 %v733_v0, %v733_v0  ;;  %v2831_v24 = vpop.f32.mrf.mxu0 }
 0x223   : > { %958 = vst.msk [vmem:[%s2783_s18 + $0xc] sm:$0xf] %vm954_vm1, %v2113_v42  ;;  %v2145_v48 = vpack.c.bf16 %v2831_v24, %v2831_v24  ;;  %v2837_v49 = vpop.f32.mrf.mxu1  ;;  %v2286_v27 = vpack.i.bf16 %v2831_v24, %v2813_v34 }
 0x224   : > { %965 = vst.msk [vmem:[%s2783_s18 + $0x28] sm:$0xf] %vm954_vm1, %v2120_v46  ;;  %v2152_v1 = vpack.c.bf16 %v2837_v49, %v2837_v49  ;;  %2247 = vrot.lane.b32.xlu0 %v2246_v43, %s2423_s20  ;;  %2252 = vrot.lane.b32.xlu1 %v2251_v40, %s2423_s20  ;;  %v703_v50 = vpop.f32.mrf.mxu0 }
 0x225   : > { %1310 = vst.msk [vmem:[%s2791_s19 + $0xc] sm:$0xf] %vm954_vm1, %v2145_v48  ;;  %v2114_v51 = vpack.c.bf16 %v703_v50, %v703_v50  ;;  %v737_v10 = vpop.f32.mrf.mxu1 }
 0x226   : > { %1317 = vst.msk [vmem:[%s2791_s19 + $0x28] sm:$0xf] %vm954_vm1, %v2152_v1  ;;  %v2256_v28 = vpack.i.bf16 %v737_v10, %v733_v0  ;;  %v2121_v29 = vpack.c.bf16 %v737_v10, %v737_v10  ;;  %v2849_v53 = vpop.f32.mrf.mxu0 }
 0x227   : > { %959 = vst.msk [vmem:[%s2783_s18 + $0x10] sm:$0xf] %vm954_vm1, %v2114_v51  ;;  %v2146_v36 = vpack.c.bf16 %v2849_v53, %v2849_v53  ;;  %v2855_v56 = vpop.f32.mrf.mxu1 }
 0x228   : > { %966 = vst.msk [vmem:[%s2783_s18 + $0x2c] sm:$0xf] %vm954_vm1, %v2121_v29  ;;  %v2153_v57 = vpack.c.bf16 %v2855_v56, %v2855_v56  ;;  %991 = vrot.lane.b32.xlu0 %v2112_v30, %s2422_s21  ;;  %2257 = vrot.lane.b32.xlu1 %v2256_v28, %s2423_s20  ;;  %v707_v58 = vpop.f32.mrf.mxu0  ;;  %v2301_v62 = vpack.i.bf16 %v2855_v56, %v2837_v49 }
 0x229   : > { %1311 = vst.msk [vmem:[%s2791_s19 + $0x10] sm:$0xf] %vm954_vm1, %v2146_v36  ;;  %v2115_v59 = vpack.c.bf16 %v707_v58, %v707_v58  ;;  %v743_v11 = vpop.f32.mrf.mxu1  ;;  %v2261_v21 = vpack.i.bf16 %v707_v58, %v703_v50 }
 0x22a   : > { %1318 = vst.msk [vmem:[%s2791_s19 + $0x2c] sm:$0xf] %vm954_vm1, %v2153_v57  ;;  %v2122_v60 = vpack.c.bf16 %v743_v11, %v743_v11  ;;  %v709_v23 = vpop.f32.mrf.mxu0 }
 0x22b   : > { %960 = vst.msk [vmem:[%s2783_s18 + $0x14] sm:$0xf] %vm954_vm1, %v2115_v59  ;;  %v2147_v61 = vpack.c.bf16 %v709_v23, %v709_v23  ;;  %v2869_v63 = vpop.f32.mrf.mxu1  ;;  %v2291_v30 = vpack.i.bf16 %v709_v23, %v2849_v53 }
 0x22c   : > { %967 = vst.msk [vmem:[%s2783_s18 + $0x30] sm:$0xf] %vm954_vm1, %v2122_v60  ;;  %v2154_v2 = vpack.c.bf16 %v2869_v63, %v2869_v63  ;;  %1007 = vrot.lane.b32.xlu0 %v2120_v46, %s2422_s21  ;;  %993 = vrot.lane.b32.xlu1 %v2113_v42, %s2422_s21  ;;  %v713_v3 = vpop.f32.mrf.mxu0 }
 0x22d   : > { %1312 = vst.msk [vmem:[%s2791_s19 + $0x14] sm:$0xf] %vm954_vm1, %v2147_v61  ;;  %v2116_v17 = vpack.c.bf16 %v713_v3, %v713_v3  ;;  %v747_v4 = vpop.f32.mrf.mxu1 }
 0x22e   : > { %1319 = vst.msk [vmem:[%s2791_s19 + $0x30] sm:$0xf] %vm954_vm1, %v2154_v2  ;;  %v2123_v35 = vpack.c.bf16 %v747_v4, %v747_v4  ;;  %v715_v5 = vpop.f32.mrf.mxu0  ;;  %v2266_v47 = vpack.i.bf16 %v747_v4, %v743_v11 }
 0x22f   : > { %961 = vst.msk [vmem:[%s2783_s18 + $0x18] sm:$0xf] %vm954_vm1, %v2116_v17  ;;  %v2148_v44 = vpack.c.bf16 %v715_v5, %v715_v5  ;;  %v749_v6 = vpop.f32.mrf.mxu1 }
 0x230   : > { %968 = vst.msk [vmem:[%s2783_s18 + $0x34] sm:$0xf] %vm954_vm1, %v2123_v35  ;;  %v2155_v7 = vpack.c.bf16 %v749_v6, %v749_v6  ;;  %1009 = vrot.lane.b32.xlu1 %v2121_v29, %s2422_s21  ;;  %995 = vrot.lane.b32.xlu0 %v2114_v51, %s2422_s21  ;;  %v717_v37 = vpop.f32.mrf.mxu0  ;;  %v2306_v16 = vpack.i.bf16 %v749_v6, %v2869_v63 }
 0x231   : > { %1313 = vst.msk [vmem:[%s2791_s19 + $0x18] sm:$0xf] %vm954_vm1, %v2148_v44  ;;  %v2117_v8 = vpack.c.bf16 %v717_v37, %v717_v37  ;;  %v753_v9 = vpop.f32.mrf.mxu1  ;;  %v2271_v22 = vpack.i.bf16 %v717_v37, %v713_v3 }
 0x232   : > { %1320 = vst.msk [vmem:[%s2791_s19 + $0x34] sm:$0xf] %vm954_vm1, %v2155_v7  ;;  %v2124_v12 = vpack.c.bf16 %v753_v9, %v753_v9  ;;  %v719_v13 = vpop.f32.mrf.mxu0 }
 0x233   : > { %962 = vst.msk [vmem:[%s2783_s18 + $0x1c] sm:$0xf] %vm954_vm1, %v2117_v8  ;;  %v2149_v14 = vpack.c.bf16 %v719_v13, %v719_v13  ;;  %v755_v25 = vpop.f32.mrf.mxu1  ;;  %v2311_v32 = vpack.i.bf16 %v719_v13, %v715_v5 }
 0x234   : > { %969 = vst.msk [vmem:[%s2783_s18 + $0x38] sm:$0xf] %vm954_vm1, %v2124_v12  ;;  %v2156_v15 = vpack.c.bf16 %v755_v25, %v755_v25  ;;  %2262 = vrot.lane.b32.xlu1 %v2261_v21, %s2423_s20  ;;  %2267 = vrot.lane.b32.xlu0 %v2266_v47, %s2423_s20 }
 0x235   : > { %1314 = vst.msk [vmem:[%s2791_s19 + $0x1c] sm:$0xf] %vm954_vm1, %v2149_v14  ;;  %v757_v41 = vpop.f32.mrf.mxu1 }
 0x236   : > { %1321 = vst.msk [vmem:[%s2791_s19 + $0x38] sm:$0xf] %vm954_vm1, %v2156_v15  ;;  %v2125_v52 = vpack.c.bf16 %v757_v41, %v757_v41  ;;  %v2276_v45 = vpack.i.bf16 %v757_v41, %v753_v9 }
 0x237   : > { %v759_v18 = vpop.f32.mrf.mxu1 }
 0x238   : > { %970 = vst.msk [vmem:[%s2783_s18 + $0x3c] sm:$0xf] %vm954_vm1, %v2125_v52  ;;  %v2157_v19 = vpack.c.bf16 %v759_v18, %v759_v18  ;;  %997 = vrot.lane.b32.xlu1 %v2115_v59, %s2422_s21  ;;  %1011 = vrot.lane.b32.xlu0 %v2122_v60, %s2422_s21  ;;  %v2316_v33 = vpack.i.bf16 %v759_v18, %v755_v25 }
 0x23a   : > { %1322 = vst.msk [vmem:[%s2791_s19 + $0x3c] sm:$0xf] %vm954_vm1, %v2157_v19 }
 0x23c   : > { %999 = vrot.lane.b32.xlu0 %v2116_v17, %s2422_s21  ;;  %2272 = vrot.lane.b32.xlu1 %v2271_v22, %s2423_s20 }
 0x240   : > { %1015 = vrot.lane.b32.xlu0 %v2124_v12, %s2422_s21  ;;  %2277 = vrot.lane.b32.xlu1 %v2276_v45, %s2423_s20 }
 0x244   : > { %2282 = vrot.lane.b32.xlu0 %v2281_v54, %s2423_s20  ;;  %1013 = vrot.lane.b32.xlu1 %v2123_v35, %s2422_s21 }
 0x248   : > { %2292 = vrot.lane.b32.xlu0 %v2291_v30, %s2423_s20  ;;  %2287 = vrot.lane.b32.xlu1 %v2286_v27, %s2423_s20 }
 0x24c   : > { %2297 = vrot.lane.b32.xlu0 %v2296_v31, %s2423_s20  ;;  %2302 = vrot.lane.b32.xlu1 %v2301_v62, %s2423_s20 }
 0x250   : > { %2307 = vrot.lane.b32.xlu0 %v2306_v16, %s2423_s20  ;;  %1001 = vrot.lane.b32.xlu1 %v2117_v8, %s2422_s21 }
 0x254   : > { %1017 = vrot.lane.b32.xlu1 %v2125_v52, %s2422_s21 }
 0x258   : > { %2312 = vrot.lane.b32.xlu1 %v2311_v32, %s2423_s20 }
 0x25c   : > { %2317 = vrot.lane.b32.xlu1 %v2316_v33, %s2423_s20 }
 0x289   : > { %v988_v26 = vpop.permute.xlu0 %987 }
 0x28a   : > { %1083 = vst.msk [vmem:[%s2933_s30] sm:$0xf] %vm954_vm1, %v988_v26 }
 0x28d   : > { %v990_v34 = vpop.permute.xlu1 %989 }
 0x28e   : > { %1084 = vst.msk [vmem:[%s2933_s30 + $0x4] sm:$0xf] %vm954_vm1, %v990_v34  ;;  %v1004_v20 = vpop.permute.xlu0 %1003 }
 0x28f   : > { %1091 = vst.msk [vmem:[%s2933_s30 + $0x20] sm:$0xf] %vm954_vm1, %v1004_v20 }
 0x292   : > { %v1006_v38 = vpop.permute.xlu1 %1005  ;;  %v2243_v55 = vpop.permute.xlu0 %2242 }
 0x293   : > { %1092 = vst.msk [vmem:[%s2933_s30 + $0x24] sm:$0xf] %vm954_vm1, %v1006_v38  ;;  %v2245_v39 = vunpack.i.h.bf16 %v2243_v55  ;;  %v2244_v40 = vunpack.i.l.bf16 %v2243_v55 }
 0x295   : > { %v2127_v42 = vpack.c.bf16 %v2245_v39, %v2245_v39  ;;  %v2126_v0 = vpack.c.bf16 %v2244_v40, %v2244_v40 }
 0x296   : > { %v2253_v43 = vpop.permute.xlu1 %2252  ;;  %v2248_v46 = vpop.permute.xlu0 %2247 }
 0x297   : > { %971 = vst.msk [vmem:[%s2783_s18 + $0x40] sm:$0xf] %vm954_vm1, %v2126_v0  ;;  %972 = vst.msk [vmem:[%s2783_s18 + $0x44] sm:$0xf] %vm954_vm1, %v2127_v42  ;;  %v2255_v24 = vunpack.i.h.bf16 %v2253_v43  ;;  %v2254_v48 = vunpack.i.l.bf16 %v2253_v43  ;;  %v2250_v49 = vunpack.i.h.bf16 %v2248_v46  ;;  %v2249_v1 = vunpack.i.l.bf16 %v2248_v46  ;;  %1021 = vrot.lane.b32.xlu1 %v2127_v42, %s2422_s21  ;;  %1019 = vrot.lane.b32.xlu0 %v2126_v0, %s2422_s21 }
 0x299   : > { %v2129_v50 = vpack.c.bf16 %v2255_v24, %v2255_v24  ;;  %v2128_v51 = vpack.c.bf16 %v2254_v48, %v2254_v48  ;;  %v2135_v10 = vpack.c.bf16 %v2250_v49, %v2250_v49  ;;  %v2134_v28 = vpack.c.bf16 %v2249_v1, %v2249_v1 }
 0x29a   : > { %v2258_v29 = vpop.permute.xlu1 %2257  ;;  %v992_v53 = vpop.permute.xlu0 %991 }
 0x29b   : > { %973 = vst.msk [vmem:[%s2783_s18 + $0x48] sm:$0xf] %vm954_vm1, %v2128_v51  ;;  %974 = vst.msk [vmem:[%s2783_s18 + $0x4c] sm:$0xf] %vm954_vm1, %v2129_v50  ;;  %v2260_v36 = vunpack.i.h.bf16 %v2258_v29  ;;  %v2259_v56 = vunpack.i.l.bf16 %v2258_v29  ;;  %1037 = vrot.lane.b32.xlu1 %v2135_v10, %s2422_s21  ;;  %1035 = vrot.lane.b32.xlu0 %v2134_v28, %s2422_s21 }
 0x29c   : > { %979 = vst.msk [vmem:[%s2783_s18 + $0x60] sm:$0xf] %vm954_vm1, %v2134_v28  ;;  %980 = vst.msk [vmem:[%s2783_s18 + $0x64] sm:$0xf] %vm954_vm1, %v2135_v10 }
 0x29d   : > { %1085 = vst.msk [vmem:[%s2933_s30 + $0x8] sm:$0xf] %vm954_vm1, %v992_v53  ;;  %v2137_v57 = vpack.c.bf16 %v2260_v36, %v2260_v36  ;;  %v2136_v58 = vpack.c.bf16 %v2259_v56, %v2259_v56 }
 0x29e   : > { %v994_v59 = vpop.permute.xlu1 %993  ;;  %v1008_v11 = vpop.permute.xlu0 %1007 }
 0x29f   : > { %981 = vst.msk [vmem:[%s2783_s18 + $0x68] sm:$0xf] %vm954_vm1, %v2136_v58  ;;  %982 = vst.msk [vmem:[%s2783_s18 + $0x6c] sm:$0xf] %vm954_vm1, %v2137_v57  ;;  %1025 = vrot.lane.b32.xlu1 %v2129_v50, %s2422_s21  ;;  %1023 = vrot.lane.b32.xlu0 %v2128_v51, %s2422_s21 }
 0x2a0   : > { %1086 = vst.msk [vmem:[%s2933_s30 + $0xc] sm:$0xf] %vm954_vm1, %v994_v59  ;;  %1093 = vst.msk [vmem:[%s2933_s30 + $0x28] sm:$0xf] %vm954_vm1, %v1008_v11 }
 0x2a2   : > { %v1010_v60 = vpop.permute.xlu1 %1009  ;;  %v996_v23 = vpop.permute.xlu0 %995 }
 0x2a3   : > { %1094 = vst.msk [vmem:[%s2933_s30 + $0x2c] sm:$0xf] %vm954_vm1, %v1010_v60  ;;  %1087 = vst.msk [vmem:[%s2933_s30 + $0x10] sm:$0xf] %vm954_vm1, %v996_v23  ;;  %1041 = vrot.lane.b32.xlu1 %v2137_v57, %s2422_s21  ;;  %1039 = vrot.lane.b32.xlu0 %v2136_v58, %s2422_s21 }
 0x2a6   : > { %v2263_v61 = vpop.permute.xlu1 %2262  ;;  %v2268_v63 = vpop.permute.xlu0 %2267 }
 0x2a7   : > { %v2265_v2 = vunpack.i.h.bf16 %v2263_v61  ;;  %v2264_v3 = vunpack.i.l.bf16 %v2263_v61  ;;  %v2270_v17 = vunpack.i.h.bf16 %v2268_v63  ;;  %v2269_v4 = vunpack.i.l.bf16 %v2268_v63 }
 0x2a9   : > { %v2131_v35 = vpack.c.bf16 %v2265_v2, %v2265_v2  ;;  %v2130_v5 = vpack.c.bf16 %v2264_v3, %v2264_v3  ;;  %v2139_v44 = vpack.c.bf16 %v2270_v17, %v2270_v17  ;;  %v2138_v6 = vpack.c.bf16 %v2269_v4, %v2269_v4 }
 0x2aa   : > { %v998_v7 = vpop.permute.xlu1 %997  ;;  %v1012_v37 = vpop.permute.xlu0 %1011 }
 0x2ab   : > { %975 = vst.msk [vmem:[%s2783_s18 + $0x50] sm:$0xf] %vm954_vm1, %v2130_v5  ;;  %976 = vst.msk [vmem:[%s2783_s18 + $0x54] sm:$0xf] %vm954_vm1, %v2131_v35  ;;  %1029 = vrot.lane.b32.xlu1 %v2131_v35, %s2422_s21  ;;  %1027 = vrot.lane.b32.xlu0 %v2130_v5, %s2422_s21 }
 0x2ac   : > { %983 = vst.msk [vmem:[%s2783_s18 + $0x70] sm:$0xf] %vm954_vm1, %v2138_v6  ;;  %984 = vst.msk [vmem:[%s2783_s18 + $0x74] sm:$0xf] %vm954_vm1, %v2139_v44 }
 0x2ad   : > { %1088 = vst.msk [vmem:[%s2933_s30 + $0x14] sm:$0xf] %vm954_vm1, %v998_v7  ;;  %1095 = vst.msk [vmem:[%s2933_s30 + $0x30] sm:$0xf] %vm954_vm1, %v1012_v37 }
 0x2ae   : > { %v2273_v8 = vpop.permute.xlu1 %2272  ;;  %v1000_v9 = vpop.permute.xlu0 %999 }
 0x2af   : > { %v2275_v21 = vunpack.i.h.bf16 %v2273_v8  ;;  %v2274_v47 = vunpack.i.l.bf16 %v2273_v8  ;;  %1089 = vst.msk [vmem:[%s2933_s30 + $0x18] sm:$0xf] %vm954_vm1, %v1000_v9  ;;  %1045 = vrot.lane.b32.xlu1 %v2139_v44, %s2422_s21  ;;  %1043 = vrot.lane.b32.xlu0 %v2138_v6, %s2422_s21 }
 0x2b1   : > { %v2133_v12 = vpack.c.bf16 %v2275_v21, %v2275_v21  ;;  %v2132_v13 = vpack.c.bf16 %v2274_v47, %v2274_v47 }
 0x2b2   : > { %v2278_v14 = vpop.permute.xlu1 %2277  ;;  %v1016_v25 = vpop.permute.xlu0 %1015 }
 0x2b3   : > { %977 = vst.msk [vmem:[%s2783_s18 + $0x58] sm:$0xf] %vm954_vm1, %v2132_v13  ;;  %978 = vst.msk [vmem:[%s2783_s18 + $0x5c] sm:$0xf] %vm954_vm1, %v2133_v12  ;;  %v2280_v15 = vunpack.i.h.bf16 %v2278_v14  ;;  %v2279_v41 = vunpack.i.l.bf16 %v2278_v14  ;;  %1033 = vrot.lane.b32.xlu1 %v2133_v12, %s2422_s21  ;;  %1031 = vrot.lane.b32.xlu0 %v2132_v13, %s2422_s21 }
 0x2b4   : > { %1097 = vst.msk [vmem:[%s2933_s30 + $0x38] sm:$0xf] %vm954_vm1, %v1016_v25  ;;  %v1375_v25 = vld [vmem:[%s2783_s18] sm:$0xff] (%p2503_p5)  }
 0x2b5   : > { %v2141_v52 = vpack.c.bf16 %v2280_v15, %v2280_v15  ;;  %v2140_v18 = vpack.c.bf16 %v2279_v41, %v2279_v41  ;;  %v1379_v15 = vld [vmem:[%s2783_s18 + $0x8] sm:$0xff] (%p2503_p5)   ;;  %v1383_v41 = vld [vmem:[%s2783_s18 + $0x10] sm:$0xff] (%p2503_p5)   ;;  %1376 = vst [vmem:[%s1358_s14] sm:$0xff] (%p2503_p5), %v1375_v25  }
 0x2b6   : > { %v1014_v19 = vpop.permute.xlu1 %1013  ;;  %v2283_v22 = vpop.permute.xlu0 %2282  ;;  %1380 = vst [vmem:[%s1358_s14 + $0x8] sm:$0xff] (%p2503_p5), %v1379_v15   ;;  %1384 = vst [vmem:[%s1358_s14 + $0x10] sm:$0xff] (%p2503_p5), %v1383_v41  }
 0x2b7   : > { %985 = vst.msk [vmem:[%s2783_s18 + $0x78] sm:$0xf] %vm954_vm1, %v2140_v18  ;;  %986 = vst.msk [vmem:[%s2783_s18 + $0x7c] sm:$0xf] %vm954_vm1, %v2141_v52  ;;  %v2285_v45 = vunpack.i.h.bf16 %v2283_v22  ;;  %v2284_v54 = vunpack.i.l.bf16 %v2283_v22  ;;  %1049 = vrot.lane.b32.xlu1 %v2141_v52, %s2422_s21  ;;  %1047 = vrot.lane.b32.xlu0 %v2140_v18, %s2422_s21 }
 0x2b8   : > { %1096 = vst.msk [vmem:[%s2933_s30 + $0x34] sm:$0xf] %vm954_vm1, %v1014_v19  ;;  %v1387_v52 = vld [vmem:[%s2783_s18 + $0x18] sm:$0xff] (%p2503_p5)   ;;  %v1391_v18 = vld [vmem:[%s2783_s18 + $0x20] sm:$0xff] (%p2503_p5)   ;;  %v1395_v19 = vld [vmem:[%s2783_s18 + $0x28] sm:$0xff] (%p2503_p5)  }
 0x2b9   : > { %v2159_v27 = vpack.c.bf16 %v2285_v45, %v2285_v45  ;;  %v2158_v30 = vpack.c.bf16 %v2284_v54, %v2284_v54  ;;  %v1399_v22 = vld [vmem:[%s2783_s18 + $0x30] sm:$0xff] (%p2503_p5)   ;;  %v1403_v45 = vld [vmem:[%s2783_s18 + $0x38] sm:$0xff] (%p2503_p5)   ;;  %v1407_v54 = vld [vmem:[%s2783_s18 + $0x40] sm:$0xff] (%p2503_p5)   ;;  %1388 = vst [vmem:[%s1358_s14 + $0x18] sm:$0xff] (%p2503_p5), %v1387_v52  }
 0x2ba   : > { %v2288_v31 = vpop.permute.xlu1 %2287  ;;  %v2293_v62 = vpop.permute.xlu0 %2292  ;;  %1392 = vst [vmem:[%s1358_s14 + $0x20] sm:$0xff] (%p2503_p5), %v1391_v18   ;;  %1396 = vst [vmem:[%s1358_s14 + $0x28] sm:$0xff] (%p2503_p5), %v1395_v19  }
 0x2bb   : > { %1323 = vst.msk [vmem:[%s2791_s19 + $0x40] sm:$0xf] %vm954_vm1, %v2158_v30  ;;  %1324 = vst.msk [vmem:[%s2791_s19 + $0x44] sm:$0xf] %vm954_vm1, %v2159_v27  ;;  %v2290_v16 = vunpack.i.h.bf16 %v2288_v31  ;;  %v2289_v32 = vunpack.i.l.bf16 %v2288_v31  ;;  %v2295_v33 = vunpack.i.h.bf16 %v2293_v62  ;;  %v2294_v26 = vunpack.i.l.bf16 %v2293_v62  ;;  %v1411_v27 = vld [vmem:[%s2783_s18 + $0x48] sm:$0xff] (%p2503_p5)   ;;  %v1415_v30 = vld [vmem:[%s2783_s18 + $0x50] sm:$0xff] (%p2503_p5)  }
 0x2bc   : > { %v1419_v31 = vld [vmem:[%s2783_s18 + $0x58] sm:$0xff] (%p2503_p5)   ;;  %1400 = vst [vmem:[%s1358_s14 + $0x30] sm:$0xff] (%p2503_p5), %v1399_v22   ;;  %1404 = vst [vmem:[%s1358_s14 + $0x38] sm:$0xff] (%p2503_p5), %v1403_v45   ;;  %v1423_v62 = vld [vmem:[%s2783_s18 + $0x60] sm:$0xff] (%p2503_p5)  }
 0x2bd   : > { %v2161_v34 = vpack.c.bf16 %v2290_v16, %v2290_v16  ;;  %v2160_v20 = vpack.c.bf16 %v2289_v32, %v2289_v32  ;;  %v2163_v38 = vpack.c.bf16 %v2295_v33, %v2295_v33  ;;  %v2162_v55 = vpack.c.bf16 %v2294_v26, %v2294_v26  ;;  %1408 = vst [vmem:[%s1358_s14 + $0x80] sm:$0xff] (%p2503_p5), %v1407_v54   ;;  %v1427_v16 = vld [vmem:[%s2783_s18 + $0x68] sm:$0xff] (%p2503_p5)   ;;  %v1431_v32 = vld [vmem:[%s2783_s18 + $0x70] sm:$0xff] (%p2503_p5)  }
 0x2be   : > { %v2303_v39 = vpop.permute.xlu1 %2302  ;;  %v2298_v40 = vpop.permute.xlu0 %2297  ;;  %1412 = vst [vmem:[%s1358_s14 + $0x88] sm:$0xff] (%p2503_p5), %v1411_v27   ;;  %1416 = vst [vmem:[%s1358_s14 + $0x90] sm:$0xff] (%p2503_p5), %v1415_v30   ;;  %v1435_v33 = vld [vmem:[%s2783_s18 + $0x78] sm:$0xff] (%p2503_p5)  }
 0x2bf   : > { %1325 = vst.msk [vmem:[%s2791_s19 + $0x48] sm:$0xf] %vm954_vm1, %v2160_v20  ;;  %1326 = vst.msk [vmem:[%s2791_s19 + $0x4c] sm:$0xf] %vm954_vm1, %v2161_v34  ;;  %v2305_v42 = vunpack.i.h.bf16 %v2303_v39  ;;  %v2304_v0 = vunpack.i.l.bf16 %v2303_v39  ;;  %v2300_v43 = vunpack.i.h.bf16 %v2298_v40  ;;  %v2299_v46 = vunpack.i.l.bf16 %v2298_v40 }
 0x2c0   : > { %1327 = vst.msk [vmem:[%s2791_s19 + $0x50] sm:$0xf] %vm954_vm1, %v2162_v55  ;;  %1328 = vst.msk [vmem:[%s2791_s19 + $0x54] sm:$0xf] %vm954_vm1, %v2163_v38 }
 0x2c1   : > { %v2169_v24 = vpack.c.bf16 %v2305_v42, %v2305_v42  ;;  %v2168_v48 = vpack.c.bf16 %v2304_v0, %v2304_v0  ;;  %v2167_v49 = vpack.c.bf16 %v2300_v43, %v2300_v43  ;;  %v2166_v1 = vpack.c.bf16 %v2299_v46, %v2299_v46  ;;  %1420 = vst [vmem:[%s1358_s14 + $0x98] sm:$0xff] (%p2503_p5), %v1419_v31  }
 0x2c2   : > { %v1002_v50 = vpop.permute.xlu1 %1001  ;;  %v2308_v51 = vpop.permute.xlu0 %2307  ;;  %1424 = vst [vmem:[%s1358_s14 + $0xa0] sm:$0xff] (%p2503_p5), %v1423_v62   ;;  %1428 = vst [vmem:[%s1358_s14 + $0xa8] sm:$0xff] (%p2503_p5), %v1427_v16  }
 0x2c3   : > { %1333 = vst.msk [vmem:[%s2791_s19 + $0x68] sm:$0xf] %vm954_vm1, %v2168_v48  ;;  %1334 = vst.msk [vmem:[%s2791_s19 + $0x6c] sm:$0xf] %vm954_vm1, %v2169_v24  ;;  %v2310_v10 = vunpack.i.h.bf16 %v2308_v51  ;;  %v2309_v28 = vunpack.i.l.bf16 %v2308_v51 }
 0x2c4   : > { %1331 = vst.msk [vmem:[%s2791_s19 + $0x60] sm:$0xf] %vm954_vm1, %v2166_v1  ;;  %1332 = vst.msk [vmem:[%s2791_s19 + $0x64] sm:$0xf] %vm954_vm1, %v2167_v49 }
 0x2c5   : > { %1090 = vst.msk [vmem:[%s2933_s30 + $0x1c] sm:$0xf] %vm954_vm1, %v1002_v50  ;;  %v2171_v29 = vpack.c.bf16 %v2310_v10, %v2310_v10  ;;  %v2170_v53 = vpack.c.bf16 %v2309_v28, %v2309_v28  ;;  %1432 = vst [vmem:[%s1358_s14 + $0xb0] sm:$0xff] (%p2503_p5), %v1431_v32  }
 0x2c6   : > { %v1018_v36 = vpop.permute.xlu1 %1017  ;;  %1436 = vst [vmem:[%s1358_s14 + $0xb8] sm:$0xff] (%p2503_p5), %v1435_v33  }
 0x2c7   : > { %1335 = vst.msk [vmem:[%s2791_s19 + $0x70] sm:$0xf] %vm954_vm1, %v2170_v53  ;;  %1336 = vst.msk [vmem:[%s2791_s19 + $0x74] sm:$0xf] %vm954_vm1, %v2171_v29 }
 0x2c8   : > { %1098 = vst.msk [vmem:[%s2933_s30 + $0x3c] sm:$0xf] %vm954_vm1, %v1018_v36 }
 0x2ca   : > { %v2313_v56 = vpop.permute.xlu1 %2312 }
 0x2cb   : > { %v2315_v57 = vunpack.i.h.bf16 %v2313_v56  ;;  %v2314_v58 = vunpack.i.l.bf16 %v2313_v56 }
 0x2cd   : > { %v2165_v59 = vpack.c.bf16 %v2315_v57, %v2315_v57  ;;  %v2164_v11 = vpack.c.bf16 %v2314_v58, %v2314_v58 }
 0x2ce   : > { %v2318_v60 = vpop.permute.xlu1 %2317 }
 0x2cf   : > { %1329 = vst.msk [vmem:[%s2791_s19 + $0x58] sm:$0xf] %vm954_vm1, %v2164_v11  ;;  %1330 = vst.msk [vmem:[%s2791_s19 + $0x5c] sm:$0xf] %vm954_vm1, %v2165_v59  ;;  %v2320_v23 = vunpack.i.h.bf16 %v2318_v60  ;;  %v2319_v61 = vunpack.i.l.bf16 %v2318_v60 }
 0x2d1   : > { %v2173_v63 = vpack.c.bf16 %v2320_v23, %v2320_v23  ;;  %v2172_v2 = vpack.c.bf16 %v2319_v61, %v2319_v61 }
 0x2d3   : > { %1337 = vst.msk [vmem:[%s2791_s19 + $0x78] sm:$0xf] %vm954_vm1, %v2172_v2  ;;  %1338 = vst.msk [vmem:[%s2791_s19 + $0x7c] sm:$0xf] %vm954_vm1, %v2173_v63 }
 0x309   : > { %v1022_v3 = vpop.permute.xlu1 %1021  ;;  %v1020_v17 = vpop.permute.xlu0 %1019 }
 0x30a   : > { %1100 = vst.msk [vmem:[%s2933_s30 + $0x44] sm:$0xf] %vm954_vm1, %v1022_v3  ;;  %1099 = vst.msk [vmem:[%s2933_s30 + $0x40] sm:$0xf] %vm954_vm1, %v1020_v17 }
 0x30d   : > { %v1038_v4 = vpop.permute.xlu1 %1037  ;;  %v1036_v35 = vpop.permute.xlu0 %1035 }
 0x30e   : > { %1108 = vst.msk [vmem:[%s2933_s30 + $0x64] sm:$0xf] %vm954_vm1, %v1038_v4  ;;  %1107 = vst.msk [vmem:[%s2933_s30 + $0x60] sm:$0xf] %vm954_vm1, %v1036_v35 }
 0x311   : > { %v1026_v5 = vpop.permute.xlu1 %1025  ;;  %v1024_v44 = vpop.permute.xlu0 %1023 }
 0x312   : > { %1102 = vst.msk [vmem:[%s2933_s30 + $0x4c] sm:$0xf] %vm954_vm1, %v1026_v5  ;;  %1101 = vst.msk [vmem:[%s2933_s30 + $0x48] sm:$0xf] %vm954_vm1, %v1024_v44 }
 0x315   : > { %v1042_v6 = vpop.permute.xlu1 %1041  ;;  %v1040_v7 = vpop.permute.xlu0 %1039 }
 0x316   : > { %1110 = vst.msk [vmem:[%s2933_s30 + $0x6c] sm:$0xf] %vm954_vm1, %v1042_v6  ;;  %1109 = vst.msk [vmem:[%s2933_s30 + $0x68] sm:$0xf] %vm954_vm1, %v1040_v7 }
 0x31d   : > { %v1030_v37 = vpop.permute.xlu1 %1029  ;;  %v1028_v8 = vpop.permute.xlu0 %1027 }
 0x31e   : > { %1104 = vst.msk [vmem:[%s2933_s30 + $0x54] sm:$0xf] %vm954_vm1, %v1030_v37  ;;  %1103 = vst.msk [vmem:[%s2933_s30 + $0x50] sm:$0xf] %vm954_vm1, %v1028_v8 }
 0x321   : > { %v1046_v9 = vpop.permute.xlu1 %1045  ;;  %v1044_v21 = vpop.permute.xlu0 %1043 }
 0x322   : > { %1112 = vst.msk [vmem:[%s2933_s30 + $0x74] sm:$0xf] %vm954_vm1, %v1046_v9  ;;  %1111 = vst.msk [vmem:[%s2933_s30 + $0x70] sm:$0xf] %vm954_vm1, %v1044_v21 }
 0x325   : > { %v1034_v47 = vpop.permute.xlu1 %1033  ;;  %v1032_v12 = vpop.permute.xlu0 %1031 }
 0x326   : > { %1106 = vst.msk [vmem:[%s2933_s30 + $0x5c] sm:$0xf] %vm954_vm1, %v1034_v47  ;;  %1105 = vst.msk [vmem:[%s2933_s30 + $0x58] sm:$0xf] %vm954_vm1, %v1032_v12  ;;  %1353 = sbr.rel (!%p2503_p5) target bundleno = 811 (0x32b), region = 40 }
 0x329   : > { %v1050_v13 = vpop.permute.xlu1 %1049  ;;  %v1048_v14 = vpop.permute.xlu0 %1047 }
 0x32a   : > { %1114 = vst.msk [vmem:[%s2933_s30 + $0x7c] sm:$0xf] %vm954_vm1, %v1050_v13  ;;  %1113 = vst.msk [vmem:[%s2933_s30 + $0x78] sm:$0xf] %vm954_vm1, %v1048_v14 }
 0x32b PF: > { %1526 = sbr.rel (!%p2503_p5) target bundleno = 823 (0x337), region = 81  ;;  %s2103_s15 = sshll.u32 (%p2503_p5), %s2407_s24, 6  ;;  %v1548_v26 = vld [vmem:[%s2933_s30] sm:$0xff] (%p2503_p5)   ;;  %v1552_v34 = vld [vmem:[%s2933_s30 + $0x8] sm:$0xff] (%p2503_p5)   ;;  %v1556_v20 = vld [vmem:[%s2933_s30 + $0x10] sm:$0xff] (%p2503_p5)  }
 0x32c   : > { %s1529_s16 = sadd.s32 (%p2503_p5), %s2103_s15, %s2516_s13  ;;  %v1560_v38 = vld [vmem:[%s2933_s30 + $0x18] sm:$0xff] (%p2503_p5)   ;;  %v1564_v55 = vld [vmem:[%s2933_s30 + $0x20] sm:$0xff] (%p2503_p5)   ;;  %v1568_v39 = vld [vmem:[%s2933_s30 + $0x28] sm:$0xff] (%p2503_p5)  }
 0x32d   : > { %s2104_s17 = sshll.u32 (%p2503_p5), %s1529_s16, 2  ;;  %v1572_v40 = vld [vmem:[%s2933_s30 + $0x30] sm:$0xff] (%p2503_p5)   ;;  %v1576_v42 = vld [vmem:[%s2933_s30 + $0x38] sm:$0xff] (%p2503_p5)   ;;  %v1580_v0 = vld [vmem:[%s2933_s30 + $0x40] sm:$0xff] (%p2503_p5)  }
 0x32e   : > { %s1531_s20 = scalar_lea.vmem (%p2503_p5), %s3174_s5, %s2104_s17  ;;  %v1584_v43 = vld [vmem:[%s2933_s30 + $0x48] sm:$0xff] (%p2503_p5)   ;;  %v1588_v46 = vld [vmem:[%s2933_s30 + $0x50] sm:$0xff] (%p2503_p5)   ;;  %v1592_v24 = vld [vmem:[%s2933_s30 + $0x58] sm:$0xff] (%p2503_p5)  }
 0x32f   : > { %1549 = vst [vmem:[%s1531_s20] sm:$0xff] (%p2503_p5), %v1548_v26   ;;  %1553 = vst [vmem:[%s1531_s20 + $0x8] sm:$0xff] (%p2503_p5), %v1552_v34   ;;  %v1596_v48 = vld [vmem:[%s2933_s30 + $0x60] sm:$0xff] (%p2503_p5)   ;;  %v1600_v49 = vld [vmem:[%s2933_s30 + $0x68] sm:$0xff] (%p2503_p5)  }
 0x330   : > { %1557 = vst [vmem:[%s1531_s20 + $0x10] sm:$0xff] %v1556_v20   ;;  %1561 = vst [vmem:[%s1531_s20 + $0x18] sm:$0xff] %v1560_v38   ;;  %v1604_v1 = vld [vmem:[%s2933_s30 + $0x70] sm:$0xff]  }
 0x331   : > { %1565 = vst [vmem:[%s1531_s20 + $0x20] sm:$0xff] %v1564_v55   ;;  %1569 = vst [vmem:[%s1531_s20 + $0x28] sm:$0xff] %v1568_v39   ;;  %v1608_v50 = vld [vmem:[%s2933_s30 + $0x78] sm:$0xff]  }
 0x332   : > { %1573 = vst [vmem:[%s1531_s20 + $0x30] sm:$0xff] %v1572_v40   ;;  %1577 = vst [vmem:[%s1531_s20 + $0x38] sm:$0xff] %v1576_v42  }
 0x333   : > { %1581 = vst [vmem:[%s1531_s20 + $0x80] sm:$0xff] %v1580_v0   ;;  %1585 = vst [vmem:[%s1531_s20 + $0x88] sm:$0xff] %v1584_v43  }
 0x334   : > { %1589 = vst [vmem:[%s1531_s20 + $0x90] sm:$0xff] %v1588_v46   ;;  %1593 = vst [vmem:[%s1531_s20 + $0x98] sm:$0xff] %v1592_v24  }
 0x335   : > { %1597 = vst [vmem:[%s1531_s20 + $0xa0] sm:$0xff] %v1596_v48   ;;  %1601 = vst [vmem:[%s1531_s20 + $0xa8] sm:$0xff] %v1600_v49  }
 0x336   : > { %1605 = vst [vmem:[%s1531_s20 + $0xb0] sm:$0xff] %v1604_v1   ;;  %1609 = vst [vmem:[%s1531_s20 + $0xb8] sm:$0xff] %v1608_v50  }
 0x337 PF: > { %1699 = sbr.rel (!%p2503_p5) target bundleno = 835 (0x343), region = 122  ;;  %s2106_s30 = sshll.u32 (%p2503_p5), %s2407_s24, 6  ;;  %v1721_v51 = vld [vmem:[%s2791_s19] sm:$0xff] (%p2503_p5)   ;;  %v1725_v10 = vld [vmem:[%s2791_s19 + $0x8] sm:$0xff] (%p2503_p5)   ;;  %v1729_v28 = vld [vmem:[%s2791_s19 + $0x10] sm:$0xff] (%p2503_p5)  }
 0x338   : > { %s1702_s8 = sadd.s32 (%p2503_p5), %s2106_s30, %s2516_s13  ;;  %v1733_v29 = vld [vmem:[%s2791_s19 + $0x18] sm:$0xff] (%p2503_p5)   ;;  %v1737_v53 = vld [vmem:[%s2791_s19 + $0x20] sm:$0xff] (%p2503_p5)   ;;  %v1741_v36 = vld [vmem:[%s2791_s19 + $0x28] sm:$0xff] (%p2503_p5)  }
 0x339   : > { %s2107_s23 = sshll.u32 (%p2503_p5), %s1702_s8, 2  ;;  %v1745_v56 = vld [vmem:[%s2791_s19 + $0x30] sm:$0xff] (%p2503_p5)   ;;  %v1749_v57 = vld [vmem:[%s2791_s19 + $0x38] sm:$0xff] (%p2503_p5)   ;;  %v1753_v58 = vld [vmem:[%s2791_s19 + $0x40] sm:$0xff] (%p2503_p5)  }
 0x33a   : > { %s1704_s10 = scalar_lea.vmem (%p2503_p5), %s3175_s6, %s2107_s23  ;;  %v1757_v59 = vld [vmem:[%s2791_s19 + $0x48] sm:$0xff] (%p2503_p5)   ;;  %v1761_v11 = vld [vmem:[%s2791_s19 + $0x50] sm:$0xff] (%p2503_p5)   ;;  %v1765_v60 = vld [vmem:[%s2791_s19 + $0x58] sm:$0xff] (%p2503_p5)  }
 0x33b   : > { %1722 = vst [vmem:[%s1704_s10] sm:$0xff] (%p2503_p5), %v1721_v51   ;;  %1726 = vst [vmem:[%s1704_s10 + $0x8] sm:$0xff] (%p2503_p5), %v1725_v10   ;;  %v1769_v23 = vld [vmem:[%s2791_s19 + $0x60] sm:$0xff] (%p2503_p5)   ;;  %v1773_v61 = vld [vmem:[%s2791_s19 + $0x68] sm:$0xff] (%p2503_p5)  }
 0x33c   : > { %1730 = vst [vmem:[%s1704_s10 + $0x10] sm:$0xff] %v1729_v28   ;;  %1734 = vst [vmem:[%s1704_s10 + $0x18] sm:$0xff] %v1733_v29   ;;  %v1777_v63 = vld [vmem:[%s2791_s19 + $0x70] sm:$0xff]   ;;  %v1781_v2 = vld [vmem:[%s2791_s19 + $0x78] sm:$0xff]  }
 0x33d   : > { %1738 = vst [vmem:[%s1704_s10 + $0x20] sm:$0xff] %v1737_v53   ;;  %1742 = vst [vmem:[%s1704_s10 + $0x28] sm:$0xff] %v1741_v36  }
 0x33e   : > { %1746 = vst [vmem:[%s1704_s10 + $0x30] sm:$0xff] %v1745_v56   ;;  %1750 = vst [vmem:[%s1704_s10 + $0x38] sm:$0xff] %v1749_v57  }
 0x33f   : > { %1754 = vst [vmem:[%s1704_s10 + $0x80] sm:$0xff] %v1753_v58   ;;  %1758 = vst [vmem:[%s1704_s10 + $0x88] sm:$0xff] %v1757_v59  }
 0x340   : > { %1762 = vst [vmem:[%s1704_s10 + $0x90] sm:$0xff] %v1761_v11   ;;  %1766 = vst [vmem:[%s1704_s10 + $0x98] sm:$0xff] %v1765_v60  }
 0x341   : > { %1770 = vst [vmem:[%s1704_s10 + $0xa0] sm:$0xff] %v1769_v23   ;;  %1774 = vst [vmem:[%s1704_s10 + $0xa8] sm:$0xff] %v1773_v61  }
 0x342   : > { %1778 = vst [vmem:[%s1704_s10 + $0xb0] sm:$0xff] %v1777_v63   ;;  %1782 = vst [vmem:[%s1704_s10 + $0xb8] sm:$0xff] %v1781_v2  }
 0x343 PF: > { %s17_s27 = sadd.s32 1, %s2419_s27   ;;  %s3177_s21 = smov %s2399_s22 }
 0x344   : > { %p14_p11 = scmp.ge.s32.totalorder %s17_s27, 6   ;;  %s3178_s22 = smov %s2514_s12 }
 0x345   : > { %s3179_s23 = smov %s2411_s25  ;;  %s3180_s24 = smov %s2415_s26 }
 0x346   : > { %s3181_s25 = smov %s3184_s28  ;;  %s3182_s26 = smov %s3188_s29 }
 0x347   :  { %16 = sbr.rel (!%p14_p11) target bundleno = 4 (0x4), region = 213 }

</bundles_post_ra>
